<compile_context>
chip_gen: v7x
topology: tpu7x:2x2x1
jax: 0.10.0
libtpu: 0.0.40
codegen_flags: <defaults>
</compile_context>

<pallas_src>
import numpy as np
import jax
import jax.numpy as jnp
from jax.experimental import pallas as pl
from jax.experimental.pallas import tpu as pltpu

CPAD = 128      # lane-padded channel width for every activation / weight


# --------------------------------------------------------------------------
# Trace-time (numpy) operator construction
# --------------------------------------------------------------------------
def _conv_taps(h, w, kh, kw, stride, pad):
    """0/1 selection matrices: taps[t] @ x_flat == im2col patch for tap t.

    Shape (kh*kw, Ho*Wo, h*w).  Spatial zero-padding is folded in
    (out-of-bounds taps are all-zero rows)."""
    ho = (h + 2 * pad - kh) // stride + 1
    wo = (w + 2 * pad - kw) // stride + 1
    taps = np.zeros((kh * kw, ho * wo, h * w), np.float32)
    for dkh in range(kh):
        for dkw in range(kw):
            t = dkh * kw + dkw
            for i in range(ho):
                hi = i * stride + dkh - pad
                if not 0 <= hi < h:
                    continue
                for j in range(wo):
                    wi = j * stride + dkw - pad
                    if 0 <= wi < w:
                        taps[t, i * wo + j, hi * w + wi] = 1.0
    return taps


def _bilinear_1d(dst, src):
    """align_corners=True interpolation weights (torch F.upsample_bilinear)."""
    if dst == 1:
        coords = np.zeros((1,), np.float64)
    else:
        coords = np.arange(dst, dtype=np.float64) * (src - 1) / (dst - 1)
    low = np.clip(np.floor(coords).astype(np.int64), 0, src - 1)
    high = np.clip(low + 1, 0, src - 1)
    frac = (coords - low).astype(np.float32)
    m = np.zeros((dst, src), np.float32)
    m[np.arange(dst), low] += 1.0 - frac
    m[np.arange(dst), high] += frac
    return m


# --------------------------------------------------------------------------
# Fused kernel: one grid step == one batch element (parallel over batch)
# --------------------------------------------------------------------------
def _fcn16_kernel(xcols_ref, w4_ref, b4_ref, wf4_ref, bf4_ref,
                  t5_ref, w5_ref, b5_ref, wf5_ref, bf5_ref, u_ref, o_ref):
    bf16 = jnp.bfloat16
    f32 = jnp.float32
    rows5 = u_ref.shape[1]          # 16
    n_taps = w5_ref.shape[0]        # 9

    # features4: one im2col matmul (im2col was done in the wrapper) + ReLU.
    y4 = jnp.maximum(
        jnp.dot(xcols_ref[...], w4_ref[...], preferred_element_type=f32)
        + b4_ref[...], 0.0)                                   # (rows4, 128) f32
    y4_bf = y4.astype(bf16)

    # fconv4 (1x1 score conv): park s4 straight into the output VMEM block so
    # it is not held in vregs across the conv5 / fconv5 / upsample chain.
    o_ref[...] = jnp.dot(y4_bf, wf4_ref[...],
                         preferred_element_type=f32) + bf4_ref[...]

    # features5: single stacked-tap gather matmul (exact 0/1 selection of the
    # bf16 y4 values -> the bf16 cast of `patch` is lossless), then 9 small
    # channel contractions on 16-row, tile-aligned slices.
    patch = jnp.dot(t5_ref[...], y4_bf, preferred_element_type=f32)
    patch_bf = patch.astype(bf16)                             # exact
    acc5 = jnp.zeros((rows5, CPAD), f32)
    for t in range(n_taps):                                   # static unroll
        acc5 = acc5 + jnp.dot(patch_bf[t * rows5:(t + 1) * rows5, :],
                              w5_ref[t], preferred_element_type=f32)
    y5_bf = jnp.maximum(acc5 + b5_ref[...], 0.0).astype(bf16)

    # fconv5 (1x1 score conv)                                 -> (rows5, 128)
    s5 = jnp.dot(y5_bf, wf5_ref[...], preferred_element_type=f32) + bf5_ref[...]

    # bilinear upsample (align_corners=True) + residual add, one bf16 matmul.
    up = jnp.dot(u_ref[...], s5.astype(bf16), preferred_element_type=f32)
    o_ref[...] = o_ref[...] + up                              # lane-dense store


# --------------------------------------------------------------------------
# Parameter init (original FCN16-shaped, f32) and packing for the kernel
# --------------------------------------------------------------------------
def init_params(key, in_ch=4, c4=8, c5=16, num_classes=5):
    ks = jax.random.split(key, 8)
    return {
        "w4": 0.1 * jax.random.normal(ks[0], (3, 3, in_ch, c4), jnp.float32),
        "b4": 0.1 * jax.random.normal(ks[1], (c4,), jnp.float32),
        "w5": 0.1 * jax.random.normal(ks[2], (3, 3, c4, c5), jnp.float32),
        "b5": 0.1 * jax.random.normal(ks[3], (c5,), jnp.float32),
        "wf4": 0.1 * jax.random.normal(ks[4], (1, 1, c4, num_classes), jnp.float32),
        "bf4": 0.1 * jax.random.normal(ks[5], (num_classes,), jnp.float32),
        "wf5": 0.1 * jax.random.normal(ks[6], (1, 1, c5, num_classes), jnp.float32),
        "bf5": 0.1 * jax.random.normal(ks[7], (num_classes,), jnp.float32),
    }


def pack_params(params, height, width):
    """Lane-pad weights to 128, precompute stacked-tap / bilinear operators."""
    f32, bf16 = jnp.float32, jnp.bfloat16
    c_in = params["w4"].shape[2]
    c4 = params["w4"].shape[3]
    c5 = params["w5"].shape[3]
    num_classes = params["wf4"].shape[3]

    def pad_to(a, shape):
        return jnp.pad(a, [(0, s - d) for d, s in zip(a.shape, shape)])

    oh4 = (height + 2 - 3) // 2 + 1
    ow4 = (width + 2 - 3) // 2 + 1
    oh5 = (oh4 + 2 - 3) // 2 + 1
    ow5 = (ow4 + 2 - 3) // 2 + 1

    # conv5 stacked-tap gather operator, tap-major rows: (9*rows5, rows4).
    t5 = _conv_taps(oh4, ow4, 3, 3, 2, 1).reshape(9 * oh5 * ow5, oh4 * ow4)

    return {
        # conv4 as a single matmul against wrapper-side im2col (K = 9*c_in),
        # K ordering tap-major / channel-minor (matches _im2col_s2p1).
        "w4": pad_to(params["w4"].reshape(9 * c_in, c4), (9 * c_in, CPAD)).astype(bf16),
        "b4": pad_to(params["b4"][None, :], (1, CPAD)).astype(f32),
        "wf4": pad_to(params["wf4"][0, 0], (CPAD, CPAD)).astype(bf16),
        "bf4": pad_to(params["bf4"][None, :], (1, CPAD)).astype(f32),
        "t5": jnp.asarray(t5, bf16),
        "w5": pad_to(params["w5"].reshape(9, c4, c5), (9, CPAD, CPAD)).astype(bf16),
        "b5": pad_to(params["b5"][None, :], (1, CPAD)).astype(f32),
        "wf5": pad_to(params["wf5"][0, 0], (CPAD, CPAD)).astype(bf16),
        "bf5": pad_to(params["bf5"][None, :], (1, CPAD)).astype(f32),
        "u": jnp.asarray(np.kron(_bilinear_1d(oh4, oh5), _bilinear_1d(ow4, ow5)), bf16),
        "spatial": (oh4, ow4, oh5, ow5),
        "num_classes": int(num_classes),
    }


# --------------------------------------------------------------------------
# Wrapper-side im2col for conv4 (layout plumbing, not compute hoisting)
# --------------------------------------------------------------------------
def _im2col_s2p1(x_nhwc):
    """3x3 stride-2 pad-1 im2col: (n,h,w,c) -> (n, ho*wo, 9*c), tap-major K."""
    n, h, w, c = x_nhwc.shape
    ho = (h + 2 - 3) // 2 + 1
    wo = (w + 2 - 3) // 2 + 1
    xp = jnp.pad(x_nhwc, ((0, 0), (1, 1), (1, 1), (0, 0)))
    cols = []
    for dh in range(3):
        for dw in range(3):
            cols.append(xp[:, dh:dh + 2 * ho - 1:2, dw:dw + 2 * wo - 1:2, :])
    cols = jnp.stack(cols, axis=3)                 # (n, ho, wo, 9, c)
    return cols.reshape(n, ho * wo, 9 * c)


# --------------------------------------------------------------------------
# Forward pass (wrapper does only NCHW<->NHWC / im2col / slice glue)
# --------------------------------------------------------------------------
def fcn16_forward(packed, x_nchw):
    n, c_in, height, width = x_nchw.shape
    oh4, ow4, oh5, ow5 = packed["spatial"]
    num_classes = packed["num_classes"]
    rows4, rows5 = oh4 * ow4, oh5 * ow5
    k4 = 9 * c_in

    x = jnp.transpose(x_nchw, (0, 2, 3, 1)).astype(jnp.float32)
    x_cols = _im2col_s2p1(x).astype(jnp.bfloat16)      # (n, rows4, 9*c_in) bf16

    operands = (x_cols, packed["w4"], packed["b4"], packed["wf4"], packed["bf4"],
                packed["t5"], packed["w5"], packed["b5"], packed["wf5"],
                packed["bf5"], packed["u"])

    flops = n * 2 * (rows4 * k4 * CPAD                 # conv4
                     + rows4 * CPAD * CPAD             # fconv4
                     + 9 * rows5 * rows4 * CPAD        # conv5 gather
                     + 9 * rows5 * CPAD * CPAD         # conv5 contraction
                     + rows5 * CPAD * CPAD             # fconv5
                     + rows4 * rows5 * CPAD)           # upsample
    bytes_accessed = sum(int(np.prod(a.shape)) * a.dtype.itemsize for a in operands)
    bytes_accessed += n * rows4 * CPAD * 4

    out = pl.pallas_call(
        _fcn16_kernel,
        out_shape=jax.ShapeDtypeStruct((n, rows4, CPAD), jnp.float32),
        grid=(n,),
        in_specs=[
            pl.BlockSpec((None, rows4, k4), lambda i: (i, 0, 0)),
            pl.BlockSpec(packed["w4"].shape, lambda i: (0, 0)),
            pl.BlockSpec(packed["b4"].shape, lambda i: (0, 0)),
            pl.BlockSpec(packed["wf4"].shape, lambda i: (0, 0)),
            pl.BlockSpec(packed["bf4"].shape, lambda i: (0, 0)),
            pl.BlockSpec(packed["t5"].shape, lambda i: (0, 0)),
            pl.BlockSpec(packed["w5"].shape, lambda i: (0, 0, 0)),
            pl.BlockSpec(packed["b5"].shape, lambda i: (0, 0)),
            pl.BlockSpec(packed["wf5"].shape, lambda i: (0, 0)),
            pl.BlockSpec(packed["bf5"].shape, lambda i: (0, 0)),
            pl.BlockSpec(packed["u"].shape, lambda i: (0, 0)),
        ],
        out_specs=pl.BlockSpec((None, rows4, CPAD), lambda i: (i, 0, 0)),
        compiler_params=pltpu.CompilerParams(
            dimension_semantics=("parallel",)),        # v7x: 1 batch elem / TC
        cost_estimate=pl.CostEstimate(flops=flops, transcendentals=0,
                                      bytes_accessed=bytes_accessed),
    )(*operands)

    y = out.reshape(n, oh4, ow4, CPAD)[..., :num_classes]       # drop lane pad
    return jnp.transpose(y, (0, 3, 1, 2))                       # NHWC -> NCHW


# --------------------------------------------------------------------------
# Pure-JAX f32 reference (correctness check only)
# --------------------------------------------------------------------------
def _conv_ref(x, w, b, stride, padding, relu):
    out = jax.lax.conv_general_dilated(
        x, w, window_strides=(stride, stride),
        padding=((padding, padding), (padding, padding)),
        dimension_numbers=("NHWC", "HWIO", "NHWC"))
    out = out + b.reshape(1, 1, 1, -1)
    return jnp.maximum(out, 0.0) if relu else out


def fcn16_ref(params, x_nchw):
    x = jnp.transpose(x_nchw, (0, 2, 3, 1)).astype(jnp.float32)
    y4 = _conv_ref(x, params["w4"], params["b4"], 2, 1, True)
    y5 = _conv_ref(y4, params["w5"], params["b5"], 2, 1, True)
    s5 = _conv_ref(y5, params["wf5"], params["bf5"], 1, 0, False)
    s4 = _conv_ref(y4, params["wf4"], params["bf4"], 1, 0, False)
    n, oh4, ow4, c = s4.shape
    _, oh5, ow5, _ = s5.shape
    m = jnp.asarray(np.kron(_bilinear_1d(oh4, oh5), _bilinear_1d(ow4, ow5)))
    up = jnp.einsum("pq,nqc->npc", m, s5.reshape(n, oh5 * ow5, c))
    up = up.reshape(n, oh4, ow4, c)
    return jnp.transpose(s4 + up, (0, 3, 1, 2))


if __name__ == "__main__":
    key = jax.random.PRNGKey(0)
    k_p, k_x = jax.random.split(key)
    params = init_params(k_p)
    x = jax.random.normal(k_x, (2, 4, 16, 16), jnp.float32)   # NCHW, like PyTorch

    packed = pack_params(params, height=16, width=16)
    out = jax.block_until_ready(fcn16_forward(packed, x))
    ref = jax.block_until_ready(fcn16_ref(params, x))

    assert out.shape == (2, 5, 8, 8), out.shape
    # bf16 matmul inputs with f32 accumulation (incl. the bf16 bilinear
    # operator) -> loosened but meaningful tolerance vs the pure-f32 reference.
    np.testing.assert_allclose(np.asarray(out), np.asarray(ref),
                               rtol=5e-2, atol=3e-2)
    print("KERNEL_OK")
</pallas_src>

<mosaic_0001>
module attributes {stable_mosaic.version = 11 : i64} {
  func.func @_fcn16_kernel(%arg0: i32, %arg1: memref<1x64x36xbf16, #tpu.memory_space<vmem>>, %arg2: memref<36x128xbf16, #tpu.memory_space<vmem>>, %arg3: memref<1x128xf32, #tpu.memory_space<vmem>>, %arg4: memref<128x128xbf16, #tpu.memory_space<vmem>>, %arg5: memref<1x128xf32, #tpu.memory_space<vmem>>, %arg6: memref<144x64xbf16, #tpu.memory_space<vmem>>, %arg7: memref<9x128x128xbf16, #tpu.memory_space<vmem>>, %arg8: memref<1x128xf32, #tpu.memory_space<vmem>>, %arg9: memref<128x128xbf16, #tpu.memory_space<vmem>>, %arg10: memref<1x128xf32, #tpu.memory_space<vmem>>, %arg11: memref<64x16xbf16, #tpu.memory_space<vmem>>, %arg12: memref<1x64x128xf32, #tpu.memory_space<vmem>>) attributes {dimension_semantics = [#tpu.dimension_semantics<parallel>], iteration_bounds = array<i64: 2>, scalar_prefetch = 0 : i64, scratch_operands = 0 : i64, tpu.core_type = #tpu.core_type<tc>, window_params = [{transform_indices = @transform_0, window_bounds = array<i64: 1, 64, 36>}, {pipeline_mode = #tpu.pipeline_mode<synchronous>, transform_indices = @transform_1, window_bounds = array<i64: 36, 128>}, {pipeline_mode = #tpu.pipeline_mode<synchronous>, transform_indices = @transform_2, window_bounds = array<i64: 1, 128>}, {pipeline_mode = #tpu.pipeline_mode<synchronous>, transform_indices = @transform_3, window_bounds = array<i64: 128, 128>}, {pipeline_mode = #tpu.pipeline_mode<synchronous>, transform_indices = @transform_4, window_bounds = array<i64: 1, 128>}, {pipeline_mode = #tpu.pipeline_mode<synchronous>, transform_indices = @transform_5, window_bounds = array<i64: 144, 64>}, {pipeline_mode = #tpu.pipeline_mode<synchronous>, transform_indices = @transform_6, window_bounds = array<i64: 9, 128, 128>}, {pipeline_mode = #tpu.pipeline_mode<synchronous>, transform_indices = @transform_7, window_bounds = array<i64: 1, 128>}, {pipeline_mode = #tpu.pipeline_mode<synchronous>, transform_indices = @transform_8, window_bounds = array<i64: 128, 128>}, {pipeline_mode = #tpu.pipeline_mode<synchronous>, transform_indices = @transform_9, window_bounds = array<i64: 1, 128>}, {pipeline_mode = #tpu.pipeline_mode<synchronous>, transform_indices = @transform_10, window_bounds = array<i64: 64, 16>}, {transform_indices = @transform_11, window_bounds = array<i64: 1, 64, 128>}]} {
    %c0 = arith.constant 0 : index
    %c0_0 = arith.constant 0 : index
    %c0_1 = arith.constant 0 : index
    %0 = vector.load %arg1[%c0, %c0_0, %c0_1] : memref<1x64x36xbf16, #tpu.memory_space<vmem>>, vector<1x64x36xbf16>
    %1 = vector.shape_cast %0 : vector<1x64x36xbf16> to vector<64x36xbf16>
    %c0_2 = arith.constant 0 : index
    %c0_3 = arith.constant 0 : index
    %2 = vector.load %arg2[%c0_2, %c0_3] : memref<36x128xbf16, #tpu.memory_space<vmem>>, vector<36x128xbf16>
    %cst = arith.constant dense<0.000000e+00> : vector<64x128xf32>
    %3 = tpu.matmul %1, %2, %cst {dimension_numbers = #tpu.dot_dimension_numbers<[1], [0], [0], [1], [0, 0, 1, 1], [], []>} : vector<64x36xbf16>, vector<36x128xbf16>, vector<64x128xf32> -> vector<64x128xf32>
    %c0_4 = arith.constant 0 : index
    %c0_5 = arith.constant 0 : index
    %4 = vector.load %arg3[%c0_4, %c0_5] : memref<1x128xf32, #tpu.memory_space<vmem>>, vector<1x128xf32>
    %5 = vector.broadcast %4 : vector<1x128xf32> to vector<64x128xf32>
    %6 = arith.addf %3, %5 : vector<64x128xf32>
    %cst_6 = arith.constant 0.000000e+00 : f32
    %7 = vector.broadcast %cst_6 : f32 to vector<64x128xf32>
    %8 = arith.maximumf %6, %7 : vector<64x128xf32>
    %9 = arith.truncf %8 : vector<64x128xf32> to vector<64x128xbf16>
    %c0_7 = arith.constant 0 : index
    %c0_8 = arith.constant 0 : index
    %10 = vector.load %arg4[%c0_7, %c0_8] : memref<128x128xbf16, #tpu.memory_space<vmem>>, vector<128x128xbf16>
    %cst_9 = arith.constant dense<0.000000e+00> : vector<64x128xf32>
    %11 = tpu.matmul %9, %10, %cst_9 {dimension_numbers = #tpu.dot_dimension_numbers<[1], [0], [0], [1], [0, 0, 1, 1], [], []>} : vector<64x128xbf16>, vector<128x128xbf16>, vector<64x128xf32> -> vector<64x128xf32>
    %c0_10 = arith.constant 0 : index
    %c0_11 = arith.constant 0 : index
    %12 = vector.load %arg5[%c0_10, %c0_11] : memref<1x128xf32, #tpu.memory_space<vmem>>, vector<1x128xf32>
    %13 = vector.broadcast %12 : vector<1x128xf32> to vector<64x128xf32>
    %14 = arith.addf %11, %13 : vector<64x128xf32>
    %c0_12 = arith.constant 0 : index
    %c0_13 = arith.constant 0 : index
    %c0_14 = arith.constant 0 : index
    %15 = vector.load %arg12[%c0_12, %c0_13, %c0_14] : memref<1x64x128xf32, #tpu.memory_space<vmem>>, vector<1x64x128xf32>
    %16 = vector.shape_cast %15 : vector<1x64x128xf32> to vector<64x128xf32>
    %17 = vector.shape_cast %14 : vector<64x128xf32> to vector<1x64x128xf32>
    tpu.vector_store %arg12[%c0_12, %c0_13, %c0_14], %17 {strides = array<i32>} : memref<1x64x128xf32, #tpu.memory_space<vmem>>, vector<1x64x128xf32>,
    %c0_15 = arith.constant 0 : index
    %c0_16 = arith.constant 0 : index
    %18 = vector.load %arg6[%c0_15, %c0_16] : memref<144x64xbf16, #tpu.memory_space<vmem>>, vector<144x64xbf16>
    %cst_17 = arith.constant dense<0.000000e+00> : vector<144x128xf32>
    %19 = tpu.matmul %18, %9, %cst_17 {dimension_numbers = #tpu.dot_dimension_numbers<[1], [0], [0], [1], [0, 0, 1, 1], [], []>} : vector<144x64xbf16>, vector<64x128xbf16>, vector<144x128xf32> -> vector<144x128xf32>
    %20 = arith.truncf %19 : vector<144x128xf32> to vector<144x128xbf16>
    %cst_18 = arith.constant 0.000000e+00 : f32
    %21 = vector.broadcast %cst_18 : f32 to vector<16x128xf32>
    %22 = vector.extract_strided_slice %20 {offsets = [0, 0], sizes = [16, 128], strides = [1, 1]} : vector<144x128xbf16> to vector<16x128xbf16>
    %c0_19 = arith.constant 0 : index
    %c0_20 = arith.constant 0 : index
    %c0_21 = arith.constant 0 : index
    %23 = vector.load %arg7[%c0_19, %c0_20, %c0_21] : memref<9x128x128xbf16, #tpu.memory_space<vmem>>, vector<1x128x128xbf16>
    %24 = vector.shape_cast %23 : vector<1x128x128xbf16> to vector<128x128xbf16>
    %cst_22 = arith.constant dense<0.000000e+00> : vector<16x128xf32>
    %25 = tpu.matmul %22, %24, %cst_22 {dimension_numbers = #tpu.dot_dimension_numbers<[1], [0], [0], [1], [0, 0, 1, 1], [], []>} : vector<16x128xbf16>, vector<128x128xbf16>, vector<16x128xf32> -> vector<16x128xf32>
    %26 = arith.addf %21, %25 : vector<16x128xf32>
    %27 = vector.extract_strided_slice %20 {offsets = [16, 0], sizes = [16, 128], strides = [1, 1]} : vector<144x128xbf16> to vector<16x128xbf16>
    %c1 = arith.constant 1 : index
    %c0_23 = arith.constant 0 : index
    %c0_24 = arith.constant 0 : index
    %28 = vector.load %arg7[%c1, %c0_23, %c0_24] : memref<9x128x128xbf16, #tpu.memory_space<vmem>>, vector<1x128x128xbf16>
    %29 = vector.shape_cast %28 : vector<1x128x128xbf16> to vector<128x128xbf16>
    %cst_25 = arith.constant dense<0.000000e+00> : vector<16x128xf32>
    %30 = tpu.matmul %27, %29, %cst_25 {dimension_numbers = #tpu.dot_dimension_numbers<[1], [0], [0], [1], [0, 0, 1, 1], [], []>} : vector<16x128xbf16>, vector<128x128xbf16>, vector<16x128xf32> -> vector<16x128xf32>
    %31 = arith.addf %26, %30 : vector<16x128xf32>
    %32 = vector.extract_strided_slice %20 {offsets = [32, 0], sizes = [16, 128], strides = [1, 1]} : vector<144x128xbf16> to vector<16x128xbf16>
    %c2 = arith.constant 2 : index
    %c0_26 = arith.constant 0 : index
    %c0_27 = arith.constant 0 : index
    %33 = vector.load %arg7[%c2, %c0_26, %c0_27] : memref<9x128x128xbf16, #tpu.memory_space<vmem>>, vector<1x128x128xbf16>
    %34 = vector.shape_cast %33 : vector<1x128x128xbf16> to vector<128x128xbf16>
    %cst_28 = arith.constant dense<0.000000e+00> : vector<16x128xf32>
    %35 = tpu.matmul %32, %34, %cst_28 {dimension_numbers = #tpu.dot_dimension_numbers<[1], [0], [0], [1], [0, 0, 1, 1], [], []>} : vector<16x128xbf16>, vector<128x128xbf16>, vector<16x128xf32> -> vector<16x128xf32>
    %36 = arith.addf %31, %35 : vector<16x128xf32>
    %37 = vector.extract_strided_slice %20 {offsets = [48, 0], sizes = [16, 128], strides = [1, 1]} : vector<144x128xbf16> to vector<16x128xbf16>
    %c3 = arith.constant 3 : index
    %c0_29 = arith.constant 0 : index
    %c0_30 = arith.constant 0 : index
    %38 = vector.load %arg7[%c3, %c0_29, %c0_30] : memref<9x128x128xbf16, #tpu.memory_space<vmem>>, vector<1x128x128xbf16>
    %39 = vector.shape_cast %38 : vector<1x128x128xbf16> to vector<128x128xbf16>
    %cst_31 = arith.constant dense<0.000000e+00> : vector<16x128xf32>
    %40 = tpu.matmul %37, %39, %cst_31 {dimension_numbers = #tpu.dot_dimension_numbers<[1], [0], [0], [1], [0, 0, 1, 1], [], []>} : vector<16x128xbf16>, vector<128x128xbf16>, vector<16x128xf32> -> vector<16x128xf32>
    %41 = arith.addf %36, %40 : vector<16x128xf32>
    %42 = vector.extract_strided_slice %20 {offsets = [64, 0], sizes = [16, 128], strides = [1, 1]} : vector<144x128xbf16> to vector<16x128xbf16>
    %c4 = arith.constant 4 : index
    %c0_32 = arith.constant 0 : index
    %c0_33 = arith.constant 0 : index
    %43 = vector.load %arg7[%c4, %c0_32, %c0_33] : memref<9x128x128xbf16, #tpu.memory_space<vmem>>, vector<1x128x128xbf16>
    %44 = vector.shape_cast %43 : vector<1x128x128xbf16> to vector<128x128xbf16>
    %cst_34 = arith.constant dense<0.000000e+00> : vector<16x128xf32>
    %45 = tpu.matmul %42, %44, %cst_34 {dimension_numbers = #tpu.dot_dimension_numbers<[1], [0], [0], [1], [0, 0, 1, 1], [], []>} : vector<16x128xbf16>, vector<128x128xbf16>, vector<16x128xf32> -> vector<16x128xf32>
    %46 = arith.addf %41, %45 : vector<16x128xf32>
    %47 = vector.extract_strided_slice %20 {offsets = [80, 0], sizes = [16, 128], strides = [1, 1]} : vector<144x128xbf16> to vector<16x128xbf16>
    %c5 = arith.constant 5 : index
    %c0_35 = arith.constant 0 : index
    %c0_36 = arith.constant 0 : index
    %48 = vector.load %arg7[%c5, %c0_35, %c0_36] : memref<9x128x128xbf16, #tpu.memory_space<vmem>>, vector<1x128x128xbf16>
    %49 = vector.shape_cast %48 : vector<1x128x128xbf16> to vector<128x128xbf16>
    %cst_37 = arith.constant dense<0.000000e+00> : vector<16x128xf32>
    %50 = tpu.matmul %47, %49, %cst_37 {dimension_numbers = #tpu.dot_dimension_numbers<[1], [0], [0], [1], [0, 0, 1, 1], [], []>} : vector<16x128xbf16>, vector<128x128xbf16>, vector<16x128xf32> -> vector<16x128xf32>
    %51 = arith.addf %46, %50 : vector<16x128xf32>
    %52 = vector.extract_strided_slice %20 {offsets = [96, 0], sizes = [16, 128], strides = [1, 1]} : vector<144x128xbf16> to vector<16x128xbf16>
    %c6 = arith.constant 6 : index
    %c0_38 = arith.constant 0 : index
    %c0_39 = arith.constant 0 : index
    %53 = vector.load %arg7[%c6, %c0_38, %c0_39] : memref<9x128x128xbf16, #tpu.memory_space<vmem>>, vector<1x128x128xbf16>
    %54 = vector.shape_cast %53 : vector<1x128x128xbf16> to vector<128x128xbf16>
    %cst_40 = arith.constant dense<0.000000e+00> : vector<16x128xf32>
    %55 = tpu.matmul %52, %54, %cst_40 {dimension_numbers = #tpu.dot_dimension_numbers<[1], [0], [0], [1], [0, 0, 1, 1], [], []>} : vector<16x128xbf16>, vector<128x128xbf16>, vector<16x128xf32> -> vector<16x128xf32>
    %56 = arith.addf %51, %55 : vector<16x128xf32>
    %57 = vector.extract_strided_slice %20 {offsets = [112, 0], sizes = [16, 128], strides = [1, 1]} : vector<144x128xbf16> to vector<16x128xbf16>
    %c7 = arith.constant 7 : index
    %c0_41 = arith.constant 0 : index
    %c0_42 = arith.constant 0 : index
    %58 = vector.load %arg7[%c7, %c0_41, %c0_42] : memref<9x128x128xbf16, #tpu.memory_space<vmem>>, vector<1x128x128xbf16>
    %59 = vector.shape_cast %58 : vector<1x128x128xbf16> to vector<128x128xbf16>
    %cst_43 = arith.constant dense<0.000000e+00> : vector<16x128xf32>
    %60 = tpu.matmul %57, %59, %cst_43 {dimension_numbers = #tpu.dot_dimension_numbers<[1], [0], [0], [1], [0, 0, 1, 1], [], []>} : vector<16x128xbf16>, vector<128x128xbf16>, vector<16x128xf32> -> vector<16x128xf32>
    %61 = arith.addf %56, %60 : vector<16x128xf32>
    %62 = vector.extract_strided_slice %20 {offsets = [128, 0], sizes = [16, 128], strides = [1, 1]} : vector<144x128xbf16> to vector<16x128xbf16>
    %c8 = arith.constant 8 : index
    %c0_44 = arith.constant 0 : index
    %c0_45 = arith.constant 0 : index
    %63 = vector.load %arg7[%c8, %c0_44, %c0_45] : memref<9x128x128xbf16, #tpu.memory_space<vmem>>, vector<1x128x128xbf16>
    %64 = vector.shape_cast %63 : vector<1x128x128xbf16> to vector<128x128xbf16>
    %cst_46 = arith.constant dense<0.000000e+00> : vector<16x128xf32>
    %65 = tpu.matmul %62, %64, %cst_46 {dimension_numbers = #tpu.dot_dimension_numbers<[1], [0], [0], [1], [0, 0, 1, 1], [], []>} : vector<16x128xbf16>, vector<128x128xbf16>, vector<16x128xf32> -> vector<16x128xf32>
    %66 = arith.addf %61, %65 : vector<16x128xf32>
    %c0_47 = arith.constant 0 : index
    %c0_48 = arith.constant 0 : index
    %67 = vector.load %arg8[%c0_47, %c0_48] : memref<1x128xf32, #tpu.memory_space<vmem>>, vector<1x128xf32>
    %68 = vector.broadcast %67 : vector<1x128xf32> to vector<16x128xf32>
    %69 = arith.addf %66, %68 : vector<16x128xf32>
    %cst_49 = arith.constant 0.000000e+00 : f32
    %70 = vector.broadcast %cst_49 : f32 to vector<16x128xf32>
    %71 = arith.maximumf %69, %70 : vector<16x128xf32>
    %72 = arith.truncf %71 : vector<16x128xf32> to vector<16x128xbf16>
    %c0_50 = arith.constant 0 : index
    %c0_51 = arith.constant 0 : index
    %73 = vector.load %arg9[%c0_50, %c0_51] : memref<128x128xbf16, #tpu.memory_space<vmem>>, vector<128x128xbf16>
    %cst_52 = arith.constant dense<0.000000e+00> : vector<16x128xf32>
    %74 = tpu.matmul %72, %73, %cst_52 {dimension_numbers = #tpu.dot_dimension_numbers<[1], [0], [0], [1], [0, 0, 1, 1], [], []>} : vector<16x128xbf16>, vector<128x128xbf16>, vector<16x128xf32> -> vector<16x128xf32>
    %c0_53 = arith.constant 0 : index
    %c0_54 = arith.constant 0 : index
    %75 = vector.load %arg10[%c0_53, %c0_54] : memref<1x128xf32, #tpu.memory_space<vmem>>, vector<1x128xf32>
    %76 = vector.broadcast %75 : vector<1x128xf32> to vector<16x128xf32>
    %77 = arith.addf %74, %76 : vector<16x128xf32>
    %c0_55 = arith.constant 0 : index
    %c0_56 = arith.constant 0 : index
    %78 = vector.load %arg11[%c0_55, %c0_56] : memref<64x16xbf16, #tpu.memory_space<vmem>>, vector<64x16xbf16>
    %79 = arith.truncf %77 : vector<16x128xf32> to vector<16x128xbf16>
    %cst_57 = arith.constant dense<0.000000e+00> : vector<64x128xf32>
    %80 = tpu.matmul %78, %79, %cst_57 {dimension_numbers = #tpu.dot_dimension_numbers<[1], [0], [0], [1], [0, 0, 1, 1], [], []>} : vector<64x16xbf16>, vector<16x128xbf16>, vector<64x128xf32> -> vector<64x128xf32>
    %c0_58 = arith.constant 0 : index
    %c0_59 = arith.constant 0 : index
    %c0_60 = arith.constant 0 : index
    %81 = vector.load %arg12[%c0_58, %c0_59, %c0_60] : memref<1x64x128xf32, #tpu.memory_space<vmem>>, vector<1x64x128xf32>
    %82 = vector.shape_cast %81 : vector<1x64x128xf32> to vector<64x128xf32>
    %83 = arith.addf %82, %80 : vector<64x128xf32>
    %c0_61 = arith.constant 0 : index
    %c0_62 = arith.constant 0 : index
    %c0_63 = arith.constant 0 : index
    %84 = vector.load %arg12[%c0_61, %c0_62, %c0_63] : memref<1x64x128xf32, #tpu.memory_space<vmem>>, vector<1x64x128xf32>
    %85 = vector.shape_cast %84 : vector<1x64x128xf32> to vector<64x128xf32>
    %86 = vector.shape_cast %83 : vector<64x128xf32> to vector<1x64x128xf32>
    tpu.vector_store %arg12[%c0_61, %c0_62, %c0_63], %86 {strides = array<i32>} : memref<1x64x128xf32, #tpu.memory_space<vmem>>, vector<1x64x128xf32>,
    return
  }
  func.func @transform_0(%arg0: i32) -> (i32, i32, i32) {
    %c0_i32 = arith.constant 0 : i32
    %c0_i32_0 = arith.constant 0 : i32
    %c0_i32_1 = arith.constant 0 : i32
    return %arg0, %c0_i32, %c0_i32_0 : i32, i32, i32
  }
  func.func @transform_1(%arg0: i32) -> (i32, i32) {
    %c0_i32 = arith.constant 0 : i32
    %c0_i32_0 = arith.constant 0 : i32
    %c0_i32_1 = arith.constant 0 : i32
    return %c0_i32, %c0_i32_0 : i32, i32
  }
  func.func @transform_2(%arg0: i32) -> (i32, i32) {
    %c0_i32 = arith.constant 0 : i32
    %c0_i32_0 = arith.constant 0 : i32
    %c0_i32_1 = arith.constant 0 : i32
    return %c0_i32, %c0_i32_0 : i32, i32
  }
  func.func @transform_3(%arg0: i32) -> (i32, i32) {
    %c0_i32 = arith.constant 0 : i32
    %c0_i32_0 = arith.constant 0 : i32
    %c0_i32_1 = arith.constant 0 : i32
    return %c0_i32, %c0_i32_0 : i32, i32
  }
  func.func @transform_4(%arg0: i32) -> (i32, i32) {
    %c0_i32 = arith.constant 0 : i32
    %c0_i32_0 = arith.constant 0 : i32
    %c0_i32_1 = arith.constant 0 : i32
    return %c0_i32, %c0_i32_0 : i32, i32
  }
  func.func @transform_5(%arg0: i32) -> (i32, i32) {
    %c0_i32 = arith.constant 0 : i32
    %c0_i32_0 = arith.constant 0 : i32
    %c0_i32_1 = arith.constant 0 : i32
    return %c0_i32, %c0_i32_0 : i32, i32
  }
  func.func @transform_6(%arg0: i32) -> (i32, i32, i32) {
    %c0_i32 = arith.constant 0 : i32
    %c0_i32_0 = arith.constant 0 : i32
    %c0_i32_1 = arith.constant 0 : i32
    %c0_i32_2 = arith.constant 0 : i32
    return %c0_i32, %c0_i32_0, %c0_i32_1 : i32, i32, i32
  }
  func.func @transform_7(%arg0: i32) -> (i32, i32) {
    %c0_i32 = arith.constant 0 : i32
    %c0_i32_0 = arith.constant 0 : i32
    %c0_i32_1 = arith.constant 0 : i32
    return %c0_i32, %c0_i32_0 : i32, i32
  }
  func.func @transform_8(%arg0: i32) -> (i32, i32) {
    %c0_i32 = arith.constant 0 : i32
    %c0_i32_0 = arith.constant 0 : i32
    %c0_i32_1 = arith.constant 0 : i32
    return %c0_i32, %c0_i32_0 : i32, i32
  }
  func.func @transform_9(%arg0: i32) -> (i32, i32) {
    %c0_i32 = arith.constant 0 : i32
    %c0_i32_0 = arith.constant 0 : i32
    %c0_i32_1 = arith.constant 0 : i32
    return %c0_i32, %c0_i32_0 : i32, i32
  }
  func.func @transform_10(%arg0: i32) -> (i32, i32) {
    %c0_i32 = arith.constant 0 : i32
    %c0_i32_0 = arith.constant 0 : i32
    %c0_i32_1 = arith.constant 0 : i32
    return %c0_i32, %c0_i32_0 : i32, i32
  }
  func.func @transform_11(%arg0: i32) -> (i32, i32, i32) {
    %c0_i32 = arith.constant 0 : i32
    %c0_i32_0 = arith.constant 0 : i32
    %c0_i32_1 = arith.constant 0 : i32
    return %arg0, %c0_i32, %c0_i32_0 : i32, i32, i32
  }
}

</mosaic_0001>

<bundles_post_ra>
// kernel: tpu_custom_call.1
= control target key start
LH: loop header
LB: loop body
LE: loop exit
PB: predicated region body
PF: predicated region fallthrough
CT: control target
= control target key end

     0   :  { %16 = vsyncpa [#allocation3], 0  ;;  %s3604_s0 = inlined_call_operand.vmem [shape: bf16[2,64,36], index: 0, kind: input, shape index: {}]   ;;  %s3605_s1 = inlined_call_operand.vmem [shape: bf16[36,128], index: 1, kind: input, shape index: {}]   ;;  %s3606_s2 = inlined_call_operand.vmem [shape: f32[1,128], index: 2, kind: input, shape index: {}]   ;;  %s3607_s3 = inlined_call_operand.vmem [shape: bf16[128,128], index: 3, kind: input, shape index: {}]   ;;  %s3608_s4 = inlined_call_operand.vmem [shape: f32[1,128], index: 4, kind: input, shape index: {}]   ;;  %s3609_s5 = inlined_call_operand.vmem [shape: bf16[144,64], index: 5, kind: input, shape index: {}]   ;;  %s3610_s6 = inlined_call_operand.hbm [shape: bf16[9,128,128], index: 6, kind: input, shape index: {}]   ;;  %s3611_s7 = inlined_call_operand.vmem [shape: f32[1,128], index: 7, kind: input, shape index: {}]   ;;  %s3612_s8 = inlined_call_operand.vmem [shape: bf16[128,128], index: 8, kind: input, shape index: {}]   ;;  %s3613_s9 = inlined_call_operand.vmem [shape: f32[1,128], index: 9, kind: input, shape index: {}]   ;;  %s3614_s10 = inlined_call_operand.vmem [shape: bf16[64,16], index: 10, kind: input, shape index: {}]   ;;  %s3615_s11 = inlined_call_operand.hbm [shape: f32[2,64,128], index: 11, kind: output, shape index: {}]  }
   0x1   :  { %17 = vsyncpa [#allocation4], 0 }
   0x2   :  { %19 = vsyncpa [#allocation4 + $0x1], 0  ;;  %s3134_s17 = smov 0   ;;  %s3136_s18 = smov 0  }
   0x3   :  { %s3138_s19 = smov 0   ;;  %s3140_s20 = smov 0  }
   0x4 LB: > { %s3155_s21 = sadd.s32 4294967295, %s3064_s20   ;;  %s2209_s22 = sadd.s32 4294967294, %s3064_s20   ;;  %s3064_s20 = sphi %s3140_s20, %s3633_s20   ;;  %s3060_s19 = sphi %s3138_s19, %s3632_s19   ;;  %s3056_s18 = sphi %s3136_s18, %s3631_s18   ;;  %s3052_s17 = sphi %s3134_s17, %s3630_s17  }
   0x5   : > { %s3159_s23 = sadd.s32 1, %s3064_s20   ;;  %s268_s24 = sadd.s32 1, %s3060_s19 }
   0x6   : > { %s265_s25 = ssub.s32 %s3064_s20, %s3159_s23  ;;  %p278_p0 = scmp.ne.s32.totalorder %s3060_s19, %s3056_s18 }
   0x7   : > { %p266_p1 = scmp.eq.s32.totalorder %s265_s25, 0  ;;  %p279_p2 = scmp.eq.s32.totalorder %s3155_s21, 1 }
   0x8   : > { %p284_p3 = scmp.ne.s32.totalorder %s3056_s18, %s3052_s17  ;;  %p285_p4 = scmp.eq.s32.totalorder %s2209_s22, 1 }
   0x9   : > { %s3170_s26 = scalar_select %p266_p1, %s3060_s19, %s268_s24  }
   0xa   : > { %p3172_p5 = por %p279_p2, %p278_p0  ;;  %p3176_p6 = por %p285_p4, %p284_p3 }
   0xb   : > { %3619 = sst [smem:[#allocation8_spill]] %s3170_s26  ;;  %p2210_p7 = scmp.ge.s32.totalorder %s3064_s20, 1 }
   0xc   : > { %s3620_s27 = scalar_select %p3172_p5, 1, 0 }
   0xd   : > { %s3621_s28 = scalar_select %p3176_p6, 1, 0 }
   0xe   : > { %p292_p8 = scmp.lt.s32.totalorder %s3064_s20, 3  ;;  %p3616_p9 = scmp.eq.s32.totalorder %s3155_s21, 0 }
   0xf   : > { %s3066_s30 = smov [#allocation2]   ;;  %s2970_s16 = scalar_lea.hbm %s3610_s6, 9216 }
  0x10   : > { %p3183_p10 = pnand %p2210_p7, %p292_p8  ;;  %s319_s12 = sshll.u32 %s3066_s30, 4  ;;  %s320_s12 = int_to_ptr.vmem [resolvable:$true] %s319_s12 }
  0x11   : > { %p2971_p13 = scmp.ne.s32.totalorder %s3610_s6, %s2970_s16  ;;  %p2977_p3 = scmp.lt.u32.totalorder %s2970_s16, %s3610_s6 }
  0x12   : > { %s3622_s29 = scalar_select %p3183_p10, 1, 0 }
  0x13   : > { %p2812_p11 = pneg %p3183_p10 }
  0x15   : > { %p3191_p12 = pnand %p3616_p9, %p2812_p11 }
  0x17   : > { %p2972_p0 = pneg %p3191_p12 }
  0x19   : > { %p2973_p1 = pnand %p2972_p0, %p2971_p13 }
  0x1b   : > { %p2974_p2 = pneg %p2973_p1 }
  0x1d   : > { %p2979_p4 = pnand %p2977_p3, %p2974_p2 }
  0x1f   : > { %2982 = shalt.err (!%p2979_p4)
}
  0x20   : > { %s2983_s26 = scalar_lea.vmem %s320_s12, 9216  ;;  %p2991_p9 = scmp.lt.s32.totalorder %s320_s12, %s320_s12 }
  0x21   : > { %p2984_p7 = scmp.ne.s32.totalorder %s320_s12, %s2983_s26  ;;  %p2992_p6 = scmp.lt.s32.totalorder %s2983_s26, %s2983_s26 }
  0x23   : > { %p2986_p8 = pnand %p2984_p7, %p2972_p0  ;;  %p2993_p5 = por %p2992_p6, %p2991_p9 }
  0x25   : > { %p2987_p11 = pneg %p2986_p8 }
  0x27   : > { %p2994_p10 = pnand %p2993_p5, %p2987_p11 }
  0x29   : > { %2997 = shalt.err (!%p2994_p10)
}
  0x2a   : > { %s3067_s14 = smov 64   ;;  %s3068_s15 = smov 4  }
  0x2b   : > { %2815 = dma.hbm_to_vmem [thread:$0]  (!%p3191_p12), %s3610_s6, 9216, %s320_s12, [#allocation3], %s3067_s14, %s3067_s14, %s3068_s15  }
  0x2c   : > { %p3624_p13 = scmp.ne.s32.totalorder %s3622_s29, 0 }
  0x2d   : > { %p3625_p1 = scmp.eq.s32.totalorder (!%p3624_p13), %s3155_s21, 0 }
  0x2e   : > { %355 = sbr.rel (%p3624_p13) target bundleno = 1341 (0x53d), region = 64 }
  0x35   : > { %3043 = dma.done.wait (%p3625_p1), [#allocation3], 9216   ;;  %p3626_p0 = pmov %p3625_p1 }
  0x36   : > { %p395_p5 = scmp.lt.s32.totalorder %s3155_s21, 1  ;;  %v2862_v0 = vld [vmem:[%s3605_s1] sm:$0xff]   ;;  %v2863_v1 = vld [vmem:[%s3605_s1 + $0x8] sm:$0xff]   ;;  %vm456_vm0 = vcmask 293888   ;;  %vm469_vm1 = vcmask 1041408   ;;  %v2871_v9 = vld [vmem:[%s3607_s3 + $0x10] sm:$0xff]  }
  0x37   : > { %3045 = vsyncadd (%p3626_p0), [#allocation3], 4294958080  ;;  %2481 = vmatprep.subr.bf16.mxu0 %v2862_v0  ;;  %v2864_v2 = vld [vmem:[%s3605_s1 + $0x10] ss:$0 sps:$4 sm:$0x33]   ;;  %v2869_v4 = vld [vmem:[%s3607_s3] sm:$0xff]  }
  0x38   : > { %s396_s26 = scalar_select %p395_p5, %s3155_s21, 1  ;;  %2482 = vmatpush3.bf16.msra.mxu0 %v2862_v0  ;;  %v471_v5 = vsel %vm469_vm1, %v2864_v2, 0  ;;  %v2870_v6 = vld [vmem:[%s3607_s3 + $0x8] sm:$0xff]   ;;  %2495 = vmatprep.subr.bf16.mxu1 %v2869_v4  ;;  %v2872_v10 = vld [vmem:[%s3607_s3 + $0x18] sm:$0xff]   ;;  %v2873_v12 = vld [vmem:[%s3607_s3 + $0x20] sm:$0xff]   ;;  %v3069_v16 = vmov 0.0  }
  0x39   : > { %2483 = vmatprep.subr.bf16.mxu0 %v2863_v1  ;;  %2496 = vmatpush3.bf16.msra.mxu1 %v2869_v4  ;;  %v2874_v13 = vld [vmem:[%s3607_s3 + $0x28] sm:$0xff]   ;;  %v2875_v14 = vld [vmem:[%s3607_s3 + $0x30] sm:$0xff]   ;;  %v2876_v15 = vld [vmem:[%s3607_s3 + $0x38] sm:$0xff]   ;;  %vm3070_vm2 = vmmov 0   ;;  %vm757_vm3 = vcmask 523264   ;;  %vm2019_vm4 = vcmask 130048  }
  0x3a   : > { %s2352_s16 = sshll.u32 %s396_s26, 5  ;;  %2497 = vmatprep.subr.bf16.mxu1 %v2870_v6  ;;  %v2218_v17 = vld [vmem:[%s3606_s2] ss:$0 sm:$0xff]  ;;  %v2888_v41 = vld [vmem:[#allocation2 + $0x48] sm:$0xff]   ;;  %v2879_v51 = vld [vmem:[%s3609_s5 + $0x10] sm:$0xff]   ;;  %s2353_s24 = sshll.u32 %s3155_s21, 10 }
  0x3b   : > { %s399_s30 = scalar_lea.vmem %s3604_s0, %s2352_s16  ;;  %v2887_v33 = vld [vmem:[#allocation2 + $0x40] sm:$0xff]   ;;  %v2878_v50 = vld [vmem:[%s3609_s5 + $0x8] sm:$0xff]   ;;  %v2880_v52 = vld [vmem:[%s3609_s5 + $0x18] sm:$0xff]   ;;  %s3554_s13 = scalar_lea.hbm %s3615_s11, %s2353_s24 }
  0x3c   : > { %v2865_v3 = vld [vmem:[%s399_s30] sm:$0xff]   ;;  %2484 = vmatpush3.bf16.msra.mxu0 %v2863_v1  ;;  %v2866_v7 = vld [vmem:[%s399_s30 + $0x8] sm:$0xff]   ;;  %v2867_v8 = vld [vmem:[%s399_s30 + $0x10] sm:$0xff]   ;;  %p3627_p9 = scmp.ne.s32.totalorder %s3620_s27, 0  ;;  %s3071_s12 = smov [#allocation5]  }
  0x3d   : > { %2487 = vmatprep.mubr.msk.bf16.mxu0 %vm456_vm0, %v2865_v3  ;;  %2805 = vmatprep.subr.msk.bf16.mxu0 %vm469_vm1, %v2864_v2  ;;  %v2868_v11 = vld [vmem:[%s399_s30 + $0x18] sm:$0xff]   ;;  %v2877_v48 = vld [vmem:[%s3609_s5] sm:$0xff]   ;;  %v2882_v54 = vld [vmem:[%s3609_s5 + $0x28] sm:$0xff]   ;;  %s392_s30 = sand.u32 1, %s3056_s18   ;;  %s3002_s29 = sshll.u32 %s3071_s12, 4  ;;  %s3003_s29 = int_to_ptr.vmem [resolvable:$false] %s3002_s29 }
  0x3e   : > { %2498 = vmatpush3.bf16.msra.mxu1 %v2870_v6  ;;  %v2886_v49 = vld [vmem:[#allocation2 + $0x80] sm:$0xff]   ;;  %v2883_v55 = vld [vmem:[%s3609_s5 + $0x30] sm:$0xff]   ;;  %v2884_v56 = vld [vmem:[%s3609_s5 + $0x38] sm:$0xff]   ;;  %s2215_s22 = sshll.u32 %s392_s30, 6  ;;  %s3563_s21 = scalar_lea.sflag [#allocation4], %s392_s30 }
  0x3f   : > { %2499 = vmatprep.subr.bf16.mxu1 %v2871_v9  ;;  %v2881_v53 = vld [vmem:[%s3609_s5 + $0x20] sm:$0xff]   ;;  %v2889_v58 = vld [vmem:[#allocation2 + $0x50] sm:$0xff]   ;;  %v2891_v59 = vld [vmem:[#allocation2 + $0x58] sm:$0xff]   ;;  %s3348_s14 = scalar_lea.vmem [#allocation5], %s2215_s22  ;;  %s3004_s15 = scalar_lea.vmem %s3003_s29, 2048 }
  0x40   : > { %2486 = vmatpush3.bf16.msra.mxu0 %v471_v5  ;;  %v2885_v57 = vld [vmem:[%s3609_s5 + $0x40] sm:$0xff]   ;;  %v2890_v60 = vld [vmem:[#allocation2 + $0x88] sm:$0xff]   ;;  %v2893_v63 = vld [vmem:[#allocation2 + $0x90] sm:$0xff]   ;;  %s2135_s26 = sshll.u32 %s3348_s14, 4  ;;  %s3556_s26 = int_to_ptr.vmem [resolvable:$true] %s2135_s26 }
  0x41   : > { %2519 = vmatprep.subr.bf16.mxu0 %v3069_v16  ;;  %v2892_v61 = vld [vmem:[#allocation2 + $0x60] sm:$0xff]   ;;  %v2894_v62 = vld [vmem:[#allocation2 + $0x68] sm:$0xff]   ;;  %v2895_v0 = vld [vmem:[#allocation2 + $0x70] sm:$0xff]   ;;  %s2998_s22 = scalar_lea.vmem %s3556_s26, 1024  ;;  %p3005_p2 = scmp.lt.s32.totalorder %s3556_s26, %s3003_s29 }
  0x42   : > { %2500 = vmatpush3.bf16.msra.mxu1 %v2871_v9  ;;  %v2896_v1 = vld [vmem:[#allocation2 + $0x98] sm:$0xff]   ;;  %v2899_v3 = vld [vmem:[#allocation2 + $0xa0] sm:$0xff]   ;;  %v2903_v4 = vld [vmem:[#allocation2 + $0xa8] sm:$0xff]   ;;  %p2999_p6 = scmp.ne.s32.totalorder %s3556_s26, %s2998_s22  ;;  %p3006_p3 = scmp.lt.s32.totalorder %s3004_s15, %s2998_s22 }
  0x43   : > { %2488 = vmatmul.mubr.msk.bf16.vlgmr.msra.gmra.mrb[0].mxu0 %vm456_vm0, %v2866_v7  ;;  %2501 = vmatprep.subr.bf16.mxu1 %v2872_v10  ;;  %v2897_v2 = vld [vmem:[#allocation2 + $0x78] sm:$0xff]   ;;  %v2906_v5 = vld [vmem:[#allocation2 + $0xb0] sm:$0xff]   ;;  %v2230_v7 = vld [vmem:[%s3608_s4] ss:$0 sm:$0xff] }
  0x44   : > { %2491 = vmatprep.mubr.msk.bf16.mxu0 %vm456_vm0, %v2867_v8  ;;  %v2908_v6 = vld [vmem:[#allocation2 + $0xb8] sm:$0xff]   ;;  %p3000_p10 = pnand %p2999_p6, %p3627_p9  ;;  %p3007_p4 = por %p3006_p3, %p3005_p2 }
  0x46   : > { %2502 = vmatpush3.bf16.msra.mxu1 %v2872_v10  ;;  %p3001_p12 = pneg %p3000_p10 }
  0x47   : > { %2503 = vmatprep.subr.bf16.mxu1 %v2873_v12 }
  0x48   : > { %p3008_p7 = pnand %p3007_p4, %p3001_p12 }
  0x4a   : > { %2504 = vmatpush3.bf16.msra.mxu1 %v2873_v12 }
  0x4b   : > { %2492 = vmatmul.mubr.msk.bf16.gmra.mrb[4].mxu0 %vm456_vm0, %v2868_v11  ;;  %2505 = vmatprep.subr.bf16.mxu1 %v2874_v13 }
  0x4c   : > { %2527 = vmatprep.mubr.msk.bf16.mxu0 %vm3070_vm2, %v3069_v16 }
  0x4e   : > { %2506 = vmatpush3.bf16.msra.mxu1 %v2874_v13 }
  0x4f   : > { %2507 = vmatprep.subr.bf16.mxu1 %v2875_v14 }
  0x52   : > { %2508 = vmatpush3.bf16.msra.mxu1 %v2875_v14 }
  0x53   : > { %2509 = vmatprep.subr.bf16.mxu1 %v2876_v15 }
  0x56   : > { %2510 = vmatpush3.bf16.msra.mxu1 %v2876_v15 }
  0x57   : > { %2563 = vmatprep.subr.bf16.mxu1 %v3069_v16 }
 0x116   : > { %v2489_v18 = vpop.f32.mrb[0].mxu0 }
 0x117   : > { %v516_v19 = vadd.f32 %v2489_v18, %v2218_v17  ;;  %v507_v20 = vpop.f32.mrb[1].mxu0 }
 0x118   : > { %v508_v21 = vadd.f32 %v2218_v17, %v507_v20  ;;  %v2490_v22 = vpop.f32.mrb[2].mxu0 }
 0x119   : > { %v519_v23 = vadd.f32 %v2490_v22, %v2218_v17  ;;  %v510_v24 = vpop.f32.mrb[3].mxu0  ;;  %v540_v26 = vmax.f32 %v516_v19, 0.0 }
 0x11a   : > { %v511_v25 = vadd.f32 %v2218_v17, %v510_v24  ;;  %v538_v28 = vmax.f32 %v508_v21, 0.0 }
 0x11b   : > { %v541_v27 = vmax.f32 %v519_v23, 0.0 }
 0x11c   : > { %v539_v29 = vmax.f32 %v511_v25, 0.0 }
 0x11d   : > { %v547_v30 = vpack.c.bf16 %v541_v27, %v540_v26 }
 0x11e   : > { %v2493_v31 = vpop.f32.mrb[4].mxu0  ;;  %v546_v32 = vpack.c.bf16 %v539_v29, %v538_v28 }
 0x11f   : > { %v532_v34 = vadd.f32 %v2493_v31, %v2218_v17  ;;  %v523_v35 = vpop.f32.mrb[5].mxu0 }
 0x120   : > { %v524_v36 = vadd.f32 %v2218_v17, %v523_v35  ;;  %v2494_v37 = vpop.f32.mrb[6].mxu0  ;;  %2511 = vmatprep.mubr.bf16.mxu1 %v546_v32  ;;  %2520 = vmatpush3.bf16.msra.mxu0 %v546_v32 }
 0x121   : > { %v535_v38 = vadd.f32 %v2494_v37, %v2218_v17  ;;  %v526_v39 = vpop.f32.mrb[7].mxu0  ;;  %2512 = vmatmul.mubr.bf16.vlgmr.msra.gmra.mrb[0].mxu1 %v547_v30  ;;  %2521 = vmatprep.subr.bf16.mxu0 %v3069_v16  ;;  %v544_v42 = vmax.f32 %v532_v34, 0.0 }
 0x122   : > { %v527_v40 = vadd.f32 %v2218_v17, %v526_v39  ;;  %2564 = vmatpush3.bf16.msra.mxu1 %v2887_v33  ;;  %v542_v44 = vmax.f32 %v524_v36, 0.0  ;;  %v2898_v33 = vld [vmem:[#allocation2] sm:$0xff]   ;;  %v2900_v36 = vld [vmem:[#allocation2 + $0x8] sm:$0xff]   ;;  %v2901_v39 = vld [vmem:[#allocation2 + $0x10] sm:$0xff]  }
 0x123   : > { %v545_v43 = vmax.f32 %v535_v38, 0.0  ;;  %2565 = vmatprep.subr.bf16.mxu1 %v3069_v16 }
 0x124   : > { %v543_v45 = vmax.f32 %v527_v40, 0.0  ;;  %2522 = vmatpush3.bf16.msra.mxu0 %v547_v30 }
 0x125   : > { %v549_v46 = vpack.c.bf16 %v545_v43, %v544_v42  ;;  %2523 = vmatprep.subr.bf16.mxu0 %v3069_v16 }
 0x126   : > { %v548_v47 = vpack.c.bf16 %v543_v45, %v542_v44  ;;  %2566 = vmatpush3.bf16.msra.mxu1 %v2888_v41  ;;  %v2910_v41 = vld [vmem:[#allocation2 + $0x100] sm:$0xff]   ;;  %v2902_v44 = vld [vmem:[#allocation2 + $0x18] sm:$0xff]   ;;  %v2912_v45 = vld [vmem:[#allocation2 + $0x108] sm:$0xff]  }
 0x127   : > { %2567 = vmatprep.subr.bf16.mxu1 %v3069_v16 }
 0x128   : > { %2515 = vmatprep.mubr.bf16.mxu1 %v548_v47  ;;  %2524 = vmatpush3.bf16.msra.mxu0 %v548_v47 }
 0x129   : > { %2516 = vmatmul.mubr.bf16.gmra.mrb[4].mxu1 %v549_v46  ;;  %2525 = vmatprep.subr.bf16.mxu0 %v3069_v16 }
 0x12a   : > { %2579 = vmatprep.mubr.msk.bf16.mxu1 %vm3070_vm2, %v3069_v16  ;;  %2568 = vmatpush3.bf16.msra.mxu1 %v2889_v58  ;;  %v2918_v58 = vld [vmem:[#allocation2 + $0x120] sm:$0xff]  }
 0x12b   : > { %2569 = vmatprep.subr.bf16.mxu1 %v3069_v16 }
 0x12c   : > { %2526 = vmatpush3.bf16.msra.mxu0 %v549_v46 }
 0x12d   : > { %2603 = vmatprep.subr.bf16.mxu0 %v3069_v16 }
 0x12e   : > { %2570 = vmatpush3.bf16.msra.mxu1 %v2891_v59 }
 0x12f   : > { %2528 = vmatmul.mubr.msk.bf16.vlgmr.msra.gmra.mrb[8].mxu0 %vm757_vm3, %v2877_v48  ;;  %2571 = vmatprep.subr.bf16.mxu1 %v3069_v16  ;;  %v2904_v48 = vld [vmem:[#allocation2 + $0x20] sm:$0xff]  }
 0x130   : > { %2531 = vmatprep.mubr.msk.bf16.mxu0 %vm3070_vm2, %v3069_v16  ;;  %2604 = vmatpush3.bf16.msra.mxu0 %v2886_v49  ;;  %v2914_v49 = vld [vmem:[#allocation2 + $0x110] sm:$0xff]  }
 0x131   : > { %2605 = vmatprep.subr.bf16.mxu0 %v3069_v16 }
 0x132   : > { %2572 = vmatpush3.bf16.msra.mxu1 %v2892_v61 }
 0x133   : > { %2573 = vmatprep.subr.bf16.mxu1 %v3069_v16 }
 0x134   : > { %2606 = vmatpush3.bf16.msra.mxu0 %v2890_v60 }
 0x135   : > { %2607 = vmatprep.subr.bf16.mxu0 %v3069_v16 }
 0x136   : > { %2574 = vmatpush3.bf16.msra.mxu1 %v2894_v62  ;;  %v2909_v62 = vld [vmem:[#allocation2 + $0x38] sm:$0xff]  }
 0x137   : > { %2532 = vmatmul.mubr.msk.bf16.gmra.mrb[12].mxu0 %vm757_vm3, %v2878_v50  ;;  %2575 = vmatprep.subr.bf16.mxu1 %v3069_v16 }
 0x138   : > { %2535 = vmatprep.mubr.msk.bf16.mxu0 %vm3070_vm2, %v3069_v16  ;;  %2608 = vmatpush3.bf16.msra.mxu0 %v2893_v63  ;;  %v2920_v63 = vld [vmem:[#allocation2 + $0x128] sm:$0xff]  }
 0x139   : > { %2609 = vmatprep.subr.bf16.mxu0 %v3069_v16 }
 0x13a   : > { %2576 = vmatpush3.bf16.msra.mxu1 %v2895_v0 }
 0x13b   : > { %2577 = vmatprep.subr.bf16.mxu1 %v3069_v16 }
 0x13c   : > { %2610 = vmatpush3.bf16.msra.mxu0 %v2896_v1 }
 0x13d   : > { %2611 = vmatprep.subr.bf16.mxu0 %v3069_v16 }
 0x13e   : > { %2578 = vmatpush3.bf16.msra.mxu1 %v2897_v2  ;;  %v2911_v2 = vld [vmem:[#allocation2 + $0xc0] sm:$0xff]  }
 0x13f   : > { %2536 = vmatmul.mubr.msk.bf16.gmra.mrb[16].mxu0 %vm757_vm3, %v2879_v51  ;;  %2583 = vmatprep.subr.bf16.mxu1 %v3069_v16 }
 0x140   : > { %2539 = vmatprep.mubr.msk.bf16.mxu0 %vm3070_vm2, %v3069_v16  ;;  %2612 = vmatpush3.bf16.msra.mxu0 %v2899_v3  ;;  %v2922_v3 = vld [vmem:[#allocation2 + $0x130] sm:$0xff]  }
 0x141   : > { %2613 = vmatprep.subr.bf16.mxu0 %v3069_v16 }
 0x144   : > { %2614 = vmatpush3.bf16.msra.mxu0 %v2903_v4 }
 0x145   : > { %2615 = vmatprep.subr.bf16.mxu0 %v3069_v16 }
 0x147   : > { %2540 = vmatmul.mubr.msk.bf16.gmra.mrb[20].mxu0 %vm757_vm3, %v2880_v52 }
 0x148   : > { %2543 = vmatprep.mubr.msk.bf16.mxu0 %vm3070_vm2, %v3069_v16  ;;  %2616 = vmatpush3.bf16.msra.mxu0 %v2906_v5 }
 0x149   : > { %2617 = vmatprep.subr.bf16.mxu0 %v3069_v16 }
 0x14c   : > { %2618 = vmatpush3.bf16.msra.mxu0 %v2908_v6 }
 0x14d   : > { %2643 = vmatprep.subr.bf16.mxu0 %v3069_v16 }
 0x14f   : > { %2544 = vmatmul.mubr.msk.bf16.gmra.mrb[24].mxu0 %vm757_vm3, %v2881_v53  ;;  %v2905_v53 = vld [vmem:[#allocation2 + $0x28] sm:$0xff]  }
 0x150   : > { %2547 = vmatprep.mubr.msk.bf16.mxu0 %vm3070_vm2, %v3069_v16 }
 0x157   : > { %2548 = vmatmul.mubr.msk.bf16.gmra.mrb[28].mxu0 %vm757_vm3, %v2882_v54  ;;  %v2916_v54 = vld [vmem:[#allocation2 + $0x118] sm:$0xff]  }
 0x158   : > { %2551 = vmatprep.mubr.msk.bf16.mxu0 %vm3070_vm2, %v3069_v16 }
 0x15f   : > { %2552 = vmatmul.mubr.msk.bf16.gmra.mrb[32].mxu0 %vm757_vm3, %v2883_v55 }
 0x160   : > { %2555 = vmatprep.mubr.msk.bf16.mxu0 %vm3070_vm2, %v3069_v16 }
 0x167   : > { %2556 = vmatmul.mubr.msk.bf16.gmra.mrb[36].mxu0 %vm757_vm3, %v2884_v56 }
 0x168   : > { %2559 = vmatprep.mubr.msk.bf16.mxu0 %vm3070_vm2, %v3069_v16 }
 0x16f   : > { %2560 = vmatmul.mubr.msk.bf16.gmra.mrb[40].mxu0 %vm757_vm3, %v2885_v57  ;;  %v2907_v57 = vld [vmem:[#allocation2 + $0x30] sm:$0xff]  }
 0x170   : > { %2619 = vmatprep.mubr.msk.bf16.mxu0 %vm3070_vm2, %v3069_v16 }
 0x1f4   : > { %v2513_v8 = vpop.f32.mrb[0].mxu1 }
 0x1f5   : > { %v664_v9 = vadd.f32 %v2513_v8, %v2230_v7  ;;  %v655_v10 = vpop.f32.mrb[1].mxu1  ;;  %v2924_v8 = vld [vmem:[#allocation2 + $0x138] sm:$0xff]  }
 0x1f6   : > { %v656_v11 = vadd.f32 %v2230_v7, %v655_v10  ;;  %v2514_v12 = vpop.f32.mrb[2].mxu1 }
 0x1f7   : > { %2774 = vst [vmem:[%s3348_s14 + $0x10] sm:$0xff] %v664_v9  ;;  %v667_v13 = vadd.f32 %v2514_v12, %v2230_v7  ;;  %v658_v14 = vpop.f32.mrb[3].mxu1  ;;  %v2926_v12 = vld [vmem:[#allocation2 + $0x180] sm:$0xff]  }
 0x1f8   : > { %2778 = vst [vmem:[%s3348_s14] sm:$0xff] %v656_v11  ;;  %v659_v15 = vadd.f32 %v2230_v7, %v658_v14  ;;  %v2915_v11 = vld [vmem:[#allocation2 + $0xd0] sm:$0xff]  }
 0x1f9   : > { %2782 = vst [vmem:[%s3348_s14 + $0x18] sm:$0xff] %v667_v13 }
 0x1fa   : > { %2786 = vst [vmem:[%s3348_s14 + $0x8] sm:$0xff] %v659_v15 }
 0x1fc   : > { %v2517_v17 = vpop.f32.mrb[4].mxu1 }
 0x1fd   : > { %v680_v18 = vadd.f32 %v2517_v17, %v2230_v7  ;;  %v671_v19 = vpop.f32.mrb[5].mxu1  ;;  %v2917_v17 = vld [vmem:[#allocation2 + $0xd8] sm:$0xff]  }
 0x1fe   : > { %v672_v20 = vadd.f32 %v2230_v7, %v671_v19  ;;  %v2518_v21 = vpop.f32.mrb[6].mxu1 }
 0x1ff   : > { %2790 = vst [vmem:[%s3348_s14 + $0x30] sm:$0xff] %v680_v18  ;;  %v683_v22 = vadd.f32 %v2518_v21, %v2230_v7  ;;  %v674_v23 = vpop.f32.mrb[7].mxu1  ;;  %v2928_v18 = vld [vmem:[#allocation2 + $0x188] sm:$0xff]   ;;  %v2919_v21 = vld [vmem:[#allocation2 + $0xe0] sm:$0xff]  }
 0x200   : > { %2794 = vst [vmem:[%s3348_s14 + $0x20] sm:$0xff] %v672_v20  ;;  %v675_v24 = vadd.f32 %v2230_v7, %v674_v23  ;;  %v2913_v7 = vld [vmem:[#allocation2 + $0xc8] sm:$0xff]  }
 0x201   : > { %2798 = vst [vmem:[%s3348_s14 + $0x38] sm:$0xff] %v683_v22  ;;  %v2930_v22 = vld [vmem:[#allocation2 + $0x190] sm:$0xff]  }
 0x202   : > { %2802 = vst [vmem:[%s3348_s14 + $0x28] sm:$0xff] %v675_v24  ;;  %v3358_v25 = vpop.f32.mrb[8].mxu0 }
 0x203   : > { %v2529_v26 = vpop.f32.mrb[9].mxu0 }
 0x204   : > { %v3360_v27 = vpop.f32.mrb[10].mxu0  ;;  %v2921_v26 = vld [vmem:[#allocation2 + $0xe8] sm:$0xff]  }
 0x205   : > { %v890_v28 = vpack.c.bf16 %v3360_v27, %v3358_v25  ;;  %v2530_v29 = vpop.f32.mrb[11].mxu0  ;;  %v2932_v27 = vld [vmem:[#allocation2 + $0x198] sm:$0xff]  }
 0x20a   : > { %v827_v30 = vpop.f32.mrb[12].mxu0 }
 0x20b   : > { %v2533_v31 = vpop.f32.mrb[13].mxu0 }
 0x20c   : > { %v830_v32 = vpop.f32.mrb[14].mxu0  ;;  %v2934_v31 = vld [vmem:[#allocation2 + $0x1a0] sm:$0xff]  }
 0x20d   : > { %v891_v34 = vpack.c.bf16 %v830_v32, %v827_v30  ;;  %v2534_v35 = vpop.f32.mrb[15].mxu0  ;;  %v2923_v30 = vld [vmem:[#allocation2 + $0xf0] sm:$0xff]  }
 0x20e   : > { %v2925_v35 = vld [vmem:[#allocation2 + $0xf8] sm:$0xff]  }
 0x20f   : > { %2580 = vmatmul.mubr.bf16.vlgmr.msra.gmra.mrb[8].mxu1 %v891_v34 }
 0x210   : > { %2584 = vmatpush3.bf16.msra.mxu1 %v2898_v33  ;;  %2599 = vmatprep.mubr.msk.bf16.mxu1 %vm3070_vm2, %v3069_v16 }
 0x211   : > { %2585 = vmatprep.subr.bf16.mxu1 %v3069_v16 }
 0x212   : > { %v835_v37 = vpop.f32.mrb[16].mxu0 }
 0x213   : > { %v2537_v38 = vpop.f32.mrb[17].mxu0 }
 0x214   : > { %2586 = vmatpush3.bf16.msra.mxu1 %v2900_v36  ;;  %v838_v40 = vpop.f32.mrb[18].mxu0  ;;  %v2936_v36 = vld [vmem:[#allocation2 + $0x1a8] sm:$0xff]   ;;  %v2938_v38 = vld [vmem:[#allocation2 + $0x1b0] sm:$0xff]  }
 0x215   : > { %2587 = vmatprep.subr.bf16.mxu1 %v3069_v16  ;;  %v892_v42 = vpack.c.bf16 %v838_v40, %v835_v37  ;;  %v2538_v43 = vpop.f32.mrb[19].mxu0  ;;  %v2927_v37 = vld [vmem:[#allocation2 + $0x140] sm:$0xff]   ;;  %v2940_v40 = vld [vmem:[#allocation2 + $0x1b8] sm:$0xff]  }
 0x216   : > { %v2933_v43 = vld [vmem:[#allocation2 + $0x158] sm:$0xff]  }
 0x217   : > { %2620 = vmatmul.mubr.bf16.vlgmr.msra.gmra.mrb[44].mxu0 %v892_v42  ;;  %v2942_v42 = vld [vmem:[#allocation2 + $0x200] sm:$0xff]  }
 0x218   : > { %2588 = vmatpush3.bf16.msra.mxu1 %v2901_v39  ;;  %2644 = vmatpush3.bf16.msra.mxu0 %v2910_v41  ;;  %v2929_v39 = vld [vmem:[#allocation2 + $0x148] sm:$0xff]   ;;  %v2931_v41 = vld [vmem:[#allocation2 + $0x150] sm:$0xff]  }
 0x219   : > { %2589 = vmatprep.subr.bf16.mxu1 %v3069_v16  ;;  %2645 = vmatprep.subr.bf16.mxu0 %v3069_v16 }
 0x21a   : > { %v3370_v46 = vpop.f32.mrb[20].mxu0  ;;  %2659 = vmatprep.mubr.msk.bf16.mxu0 %vm3070_vm2, %v3069_v16 }
 0x21b   : > { %v2541_v47 = vpop.f32.mrb[21].mxu0 }
 0x21c   : > { %2590 = vmatpush3.bf16.msra.mxu1 %v2902_v44  ;;  %2646 = vmatpush3.bf16.msra.mxu0 %v2912_v45  ;;  %v3374_v50 = vpop.f32.mrb[22].mxu0  ;;  %v2944_v44 = vld [vmem:[#allocation2 + $0x208] sm:$0xff]   ;;  %v2935_v45 = vld [vmem:[#allocation2 + $0x160] sm:$0xff]  }
 0x21d   : > { %2591 = vmatprep.subr.bf16.mxu1 %v3069_v16  ;;  %2647 = vmatprep.subr.bf16.mxu0 %v3069_v16  ;;  %v893_v51 = vpack.c.bf16 %v3374_v50, %v3370_v46  ;;  %v2542_v52 = vpop.f32.mrb[23].mxu0  ;;  %v2946_v46 = vld [vmem:[#allocation2 + $0x210] sm:$0xff]   ;;  %v2937_v47 = vld [vmem:[#allocation2 + $0x168] sm:$0xff]   ;;  %v2950_v50 = vld [vmem:[#allocation2 + $0x220] sm:$0xff]  }
 0x21e   : > { %v2952_v52 = vld [vmem:[#allocation2 + $0x228] sm:$0xff]  }
 0x220   : > { %2592 = vmatpush3.bf16.msra.mxu1 %v2904_v48  ;;  %2648 = vmatpush3.bf16.msra.mxu0 %v2914_v49  ;;  %v2948_v48 = vld [vmem:[#allocation2 + $0x218] sm:$0xff]   ;;  %v2939_v49 = vld [vmem:[#allocation2 + $0x170] sm:$0xff]  }
 0x221   : > { %2593 = vmatprep.subr.bf16.mxu1 %v3069_v16  ;;  %2649 = vmatprep.subr.bf16.mxu0 %v3069_v16 }
 0x222   : > { %v851_v55 = vpop.f32.mrb[24].mxu0 }
 0x223   : > { %v2545_v56 = vpop.f32.mrb[25].mxu0 }
 0x224   : > { %2594 = vmatpush3.bf16.msra.mxu1 %v2905_v53  ;;  %2650 = vmatpush3.bf16.msra.mxu0 %v2916_v54  ;;  %v854_v59 = vpop.f32.mrb[26].mxu0  ;;  %v2943_v53 = vld [vmem:[#allocation2 + $0x1c0] sm:$0xff]   ;;  %v2954_v54 = vld [vmem:[#allocation2 + $0x230] sm:$0xff]   ;;  %v2956_v56 = vld [vmem:[#allocation2 + $0x238] sm:$0xff]  }
 0x225   : > { %2595 = vmatprep.subr.bf16.mxu1 %v3069_v16  ;;  %2651 = vmatprep.subr.bf16.mxu0 %v3069_v16  ;;  %v894_v60 = vpack.c.bf16 %v854_v59, %v851_v55  ;;  %v2546_v61 = vpop.f32.mrb[27].mxu0  ;;  %v2945_v55 = vld [vmem:[#allocation2 + $0x1c8] sm:$0xff]   ;;  %v2951_v59 = vld [vmem:[#allocation2 + $0x1e0] sm:$0xff]  }
 0x226   : > { %v2955_v61 = vld [vmem:[#allocation2 + $0x1f0] sm:$0xff]  }
 0x228   : > { %2596 = vmatpush3.bf16.msra.mxu1 %v2907_v57  ;;  %2652 = vmatpush3.bf16.msra.mxu0 %v2918_v58  ;;  %v2947_v57 = vld [vmem:[#allocation2 + $0x1d0] sm:$0xff]   ;;  %v2949_v58 = vld [vmem:[#allocation2 + $0x1d8] sm:$0xff]  }
 0x229   : > { %2597 = vmatprep.subr.bf16.mxu1 %v3069_v16  ;;  %2653 = vmatprep.subr.bf16.mxu0 %v3069_v16 }
 0x22a   : > { %v3386_v0 = vpop.f32.mrb[28].mxu0 }
 0x22b   : > { %v2549_v1 = vpop.f32.mrb[29].mxu0 }
 0x22c   : > { %2598 = vmatpush3.bf16.msra.mxu1 %v2909_v62  ;;  %2654 = vmatpush3.bf16.msra.mxu0 %v2920_v63  ;;  %v3388_v4 = vpop.f32.mrb[30].mxu0  ;;  %v2957_v62 = vld [vmem:[#allocation2 + $0x1f8] sm:$0xff]   ;;  %v2958_v63 = vld [vmem:[%s3612_s8] sm:$0xff]   ;;  %v2960_v1 = vld [vmem:[%s3612_s8 + $0x10] sm:$0xff]  }
 0x22d   : > { %2623 = vmatprep.subr.bf16.mxu1 %v3069_v16  ;;  %2655 = vmatprep.subr.bf16.mxu0 %v3069_v16  ;;  %v895_v5 = vpack.c.bf16 %v3388_v4, %v3386_v0  ;;  %v2550_v6 = vpop.f32.mrb[31].mxu0  ;;  %v2959_v0 = vld [vmem:[%s3612_s8 + $0x8] sm:$0xff]  }
 0x22f   : > { %2600 = vmatmul.mubr.bf16.vlgmr.msra.gmra.mrb[12].mxu1 %v890_v28 }
 0x230   : > { %2624 = vmatpush3.bf16.msra.mxu1 %v2911_v2  ;;  %2656 = vmatpush3.bf16.msra.mxu0 %v2922_v3  ;;  %v2961_v2 = vld [vmem:[%s3612_s8 + $0x18] sm:$0xff]   ;;  %v2962_v3 = vld [vmem:[%s3612_s8 + $0x20] sm:$0xff]  }
 0x231   : > { %2625 = vmatprep.subr.bf16.mxu1 %v3069_v16  ;;  %2657 = vmatprep.subr.bf16.mxu0 %v3069_v16 }
 0x232   : > { %2639 = vmatprep.mubr.msk.bf16.mxu1 %vm3070_vm2, %v3069_v16  ;;  %v3401_v9 = vpop.f32.mrb[32].mxu0 }
 0x233   : > { %v2553_v10 = vpop.f32.mrb[33].mxu0 }
 0x234   : > { %2626 = vmatpush3.bf16.msra.mxu1 %v2913_v7  ;;  %2658 = vmatpush3.bf16.msra.mxu0 %v2924_v8  ;;  %v3403_v13 = vpop.f32.mrb[34].mxu0 }
 0x235   : > { %2627 = vmatprep.subr.bf16.mxu1 %v3069_v16  ;;  %2683 = vmatprep.subr.bf16.mxu0 %v3069_v16  ;;  %v896_v14 = vpack.c.bf16 %v3403_v13, %v3401_v9  ;;  %v2554_v15 = vpop.f32.mrb[35].mxu0  ;;  %v2964_v9 = vld [vmem:[%s3612_s8 + $0x30] sm:$0xff]  }
 0x237   : > { %2660 = vmatmul.mubr.bf16.vlgmr.msra.gmra.mrb[48].mxu0 %v894_v60  ;;  %v2953_v60 = vld [vmem:[#allocation2 + $0x1e8] sm:$0xff]  }
 0x238   : > { %2628 = vmatpush3.bf16.msra.mxu1 %v2915_v11  ;;  %2684 = vmatpush3.bf16.msra.mxu0 %v2926_v12  ;;  %v2965_v11 = vld [vmem:[%s3612_s8 + $0x38] sm:$0xff]  }
 0x239   : > { %2629 = vmatprep.subr.bf16.mxu1 %v3069_v16  ;;  %2685 = vmatprep.subr.bf16.mxu0 %v3069_v16 }
 0x23a   : > { %2699 = vmatprep.mubr.msk.bf16.mxu0 %vm3070_vm2, %v3069_v16  ;;  %v3413_v19 = vpop.f32.mrb[36].mxu0 }
 0x23b   : > { %v2557_v20 = vpop.f32.mrb[37].mxu0 }
 0x23c   : > { %2630 = vmatpush3.bf16.msra.mxu1 %v2917_v17  ;;  %2686 = vmatpush3.bf16.msra.mxu0 %v2928_v18  ;;  %v3415_v23 = vpop.f32.mrb[38].mxu0 }
 0x23d   : > { %2631 = vmatprep.subr.bf16.mxu1 %v3069_v16  ;;  %2687 = vmatprep.subr.bf16.mxu0 %v3069_v16  ;;  %v897_v24 = vpack.c.bf16 %v3415_v23, %v3413_v19  ;;  %v2558_v25 = vpop.f32.mrb[39].mxu0 }
 0x240   : > { %2632 = vmatpush3.bf16.msra.mxu1 %v2919_v21  ;;  %2688 = vmatpush3.bf16.msra.mxu0 %v2930_v22 }
 0x241   : > { %2633 = vmatprep.subr.bf16.mxu1 %v3069_v16  ;;  %2689 = vmatprep.subr.bf16.mxu0 %v3069_v16 }
 0x242   : > { %v3423_v28 = vpop.f32.mrb[40].mxu0 }
 0x243   : > { %v2561_v29 = vpop.f32.mrb[41].mxu0 }
 0x244   : > { %2634 = vmatpush3.bf16.msra.mxu1 %v2921_v26  ;;  %2690 = vmatpush3.bf16.msra.mxu0 %v2932_v27  ;;  %v3425_v32 = vpop.f32.mrb[42].mxu0 }
 0x245   : > { %2635 = vmatprep.subr.bf16.mxu1 %v3069_v16  ;;  %2691 = vmatprep.subr.bf16.mxu0 %v3069_v16  ;;  %v898_v33 = vpack.c.bf16 %v3425_v32, %v3423_v28  ;;  %v2562_v34 = vpop.f32.mrb[43].mxu0 }
 0x248   : > { %2636 = vmatpush3.bf16.msra.mxu1 %v2923_v30  ;;  %2692 = vmatpush3.bf16.msra.mxu0 %v2934_v31 }
 0x249   : > { %2637 = vmatprep.subr.bf16.mxu1 %v3069_v16  ;;  %2693 = vmatprep.subr.bf16.mxu0 %v3069_v16 }
 0x24c   : > { %2638 = vmatpush3.bf16.msra.mxu1 %v2925_v35  ;;  %2694 = vmatpush3.bf16.msra.mxu0 %v2936_v36 }
 0x24d   : > { %2663 = vmatprep.subr.bf16.mxu1 %v3069_v16  ;;  %2695 = vmatprep.subr.bf16.mxu0 %v3069_v16 }
 0x24f   : > { %2640 = vmatmul.mubr.bf16.vlgmr.msra.gmra.mrb[16].mxu1 %v893_v51  ;;  %v2941_v51 = vld [vmem:[#allocation2 + $0x178] sm:$0xff]  }
 0x250   : > { %2664 = vmatpush3.bf16.msra.mxu1 %v2927_v37  ;;  %2696 = vmatpush3.bf16.msra.mxu0 %v2938_v38 }
 0x251   : > { %2665 = vmatprep.subr.bf16.mxu1 %v3069_v16  ;;  %2697 = vmatprep.subr.bf16.mxu0 %v3069_v16 }
 0x252   : > { %2679 = vmatprep.mubr.msk.bf16.mxu1 %vm3070_vm2, %v3069_v16 }
 0x254   : > { %2666 = vmatpush3.bf16.msra.mxu1 %v2929_v39  ;;  %2698 = vmatpush3.bf16.msra.mxu0 %v2940_v40 }
 0x255   : > { %2667 = vmatprep.subr.bf16.mxu1 %v3069_v16  ;;  %2723 = vmatprep.subr.bf16.mxu0 %v3069_v16 }
 0x257   : > { %2700 = vmatmul.mubr.bf16.vlgmr.msra.gmra.mrb[52].mxu0 %v896_v14 }
 0x258   : > { %2668 = vmatpush3.bf16.msra.mxu1 %v2931_v41  ;;  %2724 = vmatpush3.bf16.msra.mxu0 %v2942_v42 }
 0x259   : > { %2669 = vmatprep.subr.bf16.mxu1 %v3069_v16  ;;  %2725 = vmatprep.subr.bf16.mxu0 %v3069_v16 }
 0x25a   : > { %2739 = vmatprep.mubr.msk.bf16.mxu0 %vm3070_vm2, %v3069_v16 }
 0x25c   : > { %2670 = vmatpush3.bf16.msra.mxu1 %v2933_v43  ;;  %2726 = vmatpush3.bf16.msra.mxu0 %v2944_v44 }
 0x25d   : > { %2671 = vmatprep.subr.bf16.mxu1 %v3069_v16  ;;  %2727 = vmatprep.subr.bf16.mxu0 %v3069_v16 }
 0x260   : > { %2672 = vmatpush3.bf16.msra.mxu1 %v2935_v45  ;;  %2728 = vmatpush3.bf16.msra.mxu0 %v2946_v46 }
 0x261   : > { %2673 = vmatprep.subr.bf16.mxu1 %v3069_v16  ;;  %2729 = vmatprep.subr.bf16.mxu0 %v3069_v16 }
 0x264   : > { %2674 = vmatpush3.bf16.msra.mxu1 %v2937_v47  ;;  %2730 = vmatpush3.bf16.msra.mxu0 %v2948_v48 }
 0x265   : > { %2675 = vmatprep.subr.bf16.mxu1 %v3069_v16  ;;  %2731 = vmatprep.subr.bf16.mxu0 %v3069_v16 }
 0x268   : > { %2676 = vmatpush3.bf16.msra.mxu1 %v2939_v49  ;;  %2732 = vmatpush3.bf16.msra.mxu0 %v2950_v50 }
 0x269   : > { %2677 = vmatprep.subr.bf16.mxu1 %v3069_v16  ;;  %2733 = vmatprep.subr.bf16.mxu0 %v3069_v16 }
 0x26c   : > { %2678 = vmatpush3.bf16.msra.mxu1 %v2941_v51  ;;  %2734 = vmatpush3.bf16.msra.mxu0 %v2952_v52 }
 0x26d   : > { %2703 = vmatprep.subr.bf16.mxu1 %v3069_v16  ;;  %2735 = vmatprep.subr.bf16.mxu0 %v3069_v16 }
 0x26f   : > { %2680 = vmatmul.mubr.bf16.vlgmr.msra.gmra.mrb[20].mxu1 %v895_v5  ;;  %v2963_v5 = vld [vmem:[%s3612_s8 + $0x28] sm:$0xff]  }
 0x270   : > { %2704 = vmatpush3.bf16.msra.mxu1 %v2943_v53  ;;  %2736 = vmatpush3.bf16.msra.mxu0 %v2954_v54  ;;  %v2329_v54 = vld [vmem:[%s3611_s7] ss:$0 sm:$0xff] }
 0x271   : > { %2705 = vmatprep.subr.bf16.mxu1 %v3069_v16  ;;  %2737 = vmatprep.subr.bf16.mxu0 %v3069_v16 }
 0x272   : > { %2719 = vmatprep.mubr.msk.bf16.mxu1 %vm3070_vm2, %v3069_v16 }
 0x274   : > { %2706 = vmatpush3.bf16.msra.mxu1 %v2945_v55  ;;  %2738 = vmatpush3.bf16.msra.mxu0 %v2956_v56 }
 0x275   : > { %2707 = vmatprep.subr.bf16.mxu1 %v3069_v16 }
 0x277   : > { %2740 = vmatmul.mubr.bf16.vlgmr.msra.gmra.mrb[56].mxu0 %v898_v33 }
 0x278   : > { %2708 = vmatpush3.bf16.msra.mxu1 %v2947_v57 }
 0x279   : > { %2709 = vmatprep.subr.bf16.mxu1 %v3069_v16 }
 0x27c   : > { %2710 = vmatpush3.bf16.msra.mxu1 %v2949_v58 }
 0x27d   : > { %2711 = vmatprep.subr.bf16.mxu1 %v3069_v16 }
 0x280   : > { %2712 = vmatpush3.bf16.msra.mxu1 %v2951_v59 }
 0x281   : > { %2713 = vmatprep.subr.bf16.mxu1 %v3069_v16 }
 0x284   : > { %2714 = vmatpush3.bf16.msra.mxu1 %v2953_v60 }
 0x285   : > { %2715 = vmatprep.subr.bf16.mxu1 %v3069_v16 }
 0x288   : > { %2716 = vmatpush3.bf16.msra.mxu1 %v2955_v61 }
 0x289   : > { %2717 = vmatprep.subr.bf16.mxu1 %v3069_v16 }
 0x28c   : > { %2718 = vmatpush3.bf16.msra.mxu1 %v2957_v62 }
 0x28d   : > { %2743 = vmatprep.subr.bf16.mxu1 %v3069_v16 }
 0x28f   : > { %2720 = vmatmul.mubr.bf16.vlgmr.msra.gmra.mrb[24].mxu1 %v897_v24 }
 0x290   : > { %2759 = vmatprep.mubr.msk.bf16.mxu1 %vm3070_vm2, %v3069_v16  ;;  %2744 = vmatpush3.bf16.msra.mxu1 %v2958_v63 }
 0x291   : > { %2745 = vmatprep.subr.bf16.mxu1 %v3069_v16 }
 0x294   : > { %2746 = vmatpush3.bf16.msra.mxu1 %v2959_v0 }
 0x295   : > { %2747 = vmatprep.subr.bf16.mxu1 %v3069_v16 }
 0x298   : > { %2748 = vmatpush3.bf16.msra.mxu1 %v2960_v1  ;;  %v2966_v1 = vld [vmem:[%s3614_s10] sm:$0xff]  }
 0x299   : > { %2749 = vmatprep.subr.bf16.mxu1 %v3069_v16  ;;  %2765 = vmatprep.mubr.msk.bf16.mxu0 %vm2019_vm4, %v2966_v1 }
 0x29c   : > { %2750 = vmatpush3.bf16.msra.mxu1 %v2961_v2  ;;  %v2330_v2 = vld [vmem:[%s3613_s9] ss:$0 sm:$0xff] }
 0x29d   : > { %2751 = vmatprep.subr.bf16.mxu1 %v3069_v16 }
 0x2a0   : > { %2752 = vmatpush3.bf16.msra.mxu1 %v2962_v3 }
 0x2a1   : > { %2753 = vmatprep.subr.bf16.mxu1 %v3069_v16 }
 0x2a4   : > { %2754 = vmatpush3.bf16.msra.mxu1 %v2963_v5 }
 0x2a5   : > { %2755 = vmatprep.subr.bf16.mxu1 %v3069_v16 }
 0x2a8   : > { %2756 = vmatpush3.bf16.msra.mxu1 %v2964_v9 }
 0x2a9   : > { %2757 = vmatprep.subr.bf16.mxu1 %v3069_v16 }
 0x2ac   : > { %2758 = vmatpush3.bf16.msra.mxu1 %v2965_v11  ;;  %v2968_v11 = vld [vmem:[%s3614_s10 + $0x10] sm:$0xff]  }
 0x2e2   : > { %v1014_v4 = vpop.f32.mrb[8].mxu1 }
 0x2e3   : > { %v2581_v6 = vpop.f32.mrb[9].mxu1 }
 0x2e4   : > { %v1017_v7 = vpop.f32.mrb[10].mxu1 }
 0x2e5   : > { %v2582_v8 = vpop.f32.mrb[11].mxu1 }
 0x2ea   : > { %v1209_v10 = vpop.f32.mrb[44].mxu0 }
 0x2eb   : > { %v2621_v12 = vpop.f32.mrb[45].mxu0 }
 0x2ec   : > { %v1212_v13 = vpop.f32.mrb[46].mxu0  ;;  %v2969_v12 = vld [vmem:[%s3614_s10 + $0x18] sm:$0xff]  }
 0x2ed   : > { %v2622_v14 = vpop.f32.mrb[47].mxu0 }
 0x2ee   : > { %v2775_v14 = vld [vmem:[%s3348_s14 + $0x10] sm:$0xff] }
 0x302   : > { %v1103_v15 = vpop.f32.mrb[12].mxu1 }
 0x303   : > { %v1104_v17 = vadd.f32 %v1103_v15, %v1014_v4  ;;  %v2601_v18 = vpop.f32.mrb[13].mxu1 }
 0x304   : > { %v1106_v19 = vpop.f32.mrb[14].mxu1  ;;  %v2779_v18 = vld [vmem:[%s3348_s14] sm:$0xff] }
 0x305   : > { %v1107_v20 = vadd.f32 %v1106_v19, %v1017_v7  ;;  %v2602_v21 = vpop.f32.mrb[15].mxu1  ;;  %v1216_v22 = vadd.f32 %v1209_v10, %v1104_v17  ;;  %v2967_v10 = vld [vmem:[%s3614_s10 + $0x8] sm:$0xff]  }
 0x306   : > { %v2783_v21 = vld [vmem:[%s3348_s14 + $0x18] sm:$0xff] }
 0x307   : > { %v1217_v23 = vadd.f32 %v1212_v13, %v1107_v20 }
 0x30a   : > { %v1425_v24 = vpop.f32.mrb[48].mxu0 }
 0x30b   : > { %v2661_v25 = vpop.f32.mrb[49].mxu0 }
 0x30c   : > { %v1428_v16 = vpop.f32.mrb[50].mxu0 }
 0x30d   : > { %v2662_v26 = vpop.f32.mrb[51].mxu0 }
 0x30e   : > { %v2791_v26 = vld [vmem:[%s3348_s14 + $0x30] sm:$0xff] }
 0x322   : > { %v1317_v27 = vpop.f32.mrb[16].mxu1 }
 0x323   : > { %v1324_v28 = vadd.f32 %v1317_v27, %v1216_v22  ;;  %v2641_v29 = vpop.f32.mrb[17].mxu1 }
 0x324   : > { %v1320_v30 = vpop.f32.mrb[18].mxu1  ;;  %v2795_v29 = vld [vmem:[%s3348_s14 + $0x20] sm:$0xff] }
 0x325   : > { %v1325_v31 = vadd.f32 %v1320_v30, %v1217_v23  ;;  %v2642_v32 = vpop.f32.mrb[19].mxu1  ;;  %v1432_v33 = vadd.f32 %v1425_v24, %v1324_v28  ;;  %v2787_v24 = vld [vmem:[%s3348_s14 + $0x8] sm:$0xff] }
 0x326   : > { %v2799_v32 = vld [vmem:[%s3348_s14 + $0x38] sm:$0xff] }
 0x327   : > { %v1433_v34 = vadd.f32 %v1428_v16, %v1325_v31 }
 0x32a   : > { %v1641_v35 = vpop.f32.mrb[52].mxu0 }
 0x32b   : > { %v2701_v36 = vpop.f32.mrb[53].mxu0 }
 0x32c   : > { %v1644_v37 = vpop.f32.mrb[54].mxu0 }
 0x32d   : > { %v2702_v38 = vpop.f32.mrb[55].mxu0 }
 0x342   : > { %v1533_v39 = vpop.f32.mrb[20].mxu1 }
 0x343   : > { %v1540_v40 = vadd.f32 %v1533_v39, %v1432_v33  ;;  %v2681_v41 = vpop.f32.mrb[21].mxu1 }
 0x344   : > { %v1536_v42 = vpop.f32.mrb[22].mxu1 }
 0x345   : > { %v1541_v43 = vadd.f32 %v1536_v42, %v1433_v34  ;;  %v2682_v44 = vpop.f32.mrb[23].mxu1  ;;  %v1648_v45 = vadd.f32 %v1641_v35, %v1540_v40  ;;  %v2803_v35 = vld [vmem:[%s3348_s14 + $0x28] sm:$0xff] }
 0x347   : > { %v1649_v46 = vadd.f32 %v1644_v37, %v1541_v43 }
 0x34a   : > { %v1857_v47 = vpop.f32.mrb[56].mxu0 }
 0x34b   : > { %v2741_v48 = vpop.f32.mrb[57].mxu0 }
 0x34c   : > { %v1860_v49 = vpop.f32.mrb[58].mxu0 }
 0x34d   : > { %v2742_v50 = vpop.f32.mrb[59].mxu0 }
 0x362   : > { %v1749_v51 = vpop.f32.mrb[24].mxu1 }
 0x363   : > { %v1756_v52 = vadd.f32 %v1749_v51, %v1648_v45  ;;  %v2721_v53 = vpop.f32.mrb[25].mxu1 }
 0x364   : > { %v1752_v55 = vpop.f32.mrb[26].mxu1 }
 0x365   : > { %v1864_v56 = vadd.f32 %v1857_v47, %v1756_v52  ;;  %v1757_v57 = vadd.f32 %v1752_v55, %v1649_v46  ;;  %v2722_v58 = vpop.f32.mrb[27].mxu1 }
 0x367   : > { %v1873_v59 = vadd.f32 %v2329_v54, %v1864_v56  ;;  %v1865_v60 = vadd.f32 %v1860_v49, %v1757_v57 }
 0x369   : > { %v1874_v61 = vadd.f32 %v2329_v54, %v1865_v60  ;;  %v1875_v62 = vmax.f32 %v1873_v59, 0.0 }
 0x36b   : > { %v1876_v63 = vmax.f32 %v1874_v61, 0.0 }
 0x36d   : > { %v1877_v0 = vpack.c.bf16 %v1876_v63, %v1875_v62 }
 0x36f   : > { %2760 = vmatmul.mubr.bf16.vlgmr.msra.gmra.mrb[28].mxu1 %v1877_v0 }
 0x442   : > { %v1983_v3 = vpop.f32.mrb[28].mxu1 }
 0x443   : > { %v2761_v4 = vpop.f32.mrb[29].mxu1  ;;  %v1984_v6 = vadd.f32 %v2330_v2, %v1983_v3 }
 0x444   : > { %v1986_v5 = vpop.f32.mrb[30].mxu1 }
 0x445   : > { %v1987_v7 = vadd.f32 %v2330_v2, %v1986_v5  ;;  %v2762_v8 = vpop.f32.mrb[31].mxu1 }
 0x447   : > { %v1998_v9 = vpack.c.bf16 %v1987_v7, %v1984_v6 }
 0x449   : > { %2763 = vmatprep.subr.bf16.mxu0 %v1998_v9 }
 0x44a   : > { %2764 = vmatpush3.bf16.msra.mxu0 %v1998_v9 }
 0x44d   : > { %2766 = vmatmul.mubr.msk.bf16.vlgmr.msra.gmra.mrb[60].mxu0 %vm2019_vm4, %v2967_v10 }
 0x44e   : > { %2769 = vmatprep.mubr.msk.bf16.mxu0 %vm2019_vm4, %v2968_v11 }
 0x455   : > { %2770 = vmatmul.mubr.msk.bf16.gmra.mrb[64].mxu0 %vm2019_vm4, %v2969_v12 }
 0x520   : > { %v2767_v13 = vpop.f32.mrb[60].mxu0 }
 0x521   : > { %v2776_v15 = vadd.f32 %v2775_v14, %v2767_v13  ;;  %v2066_v17 = vpop.f32.mrb[61].mxu0 }
 0x522   : > { %v2780_v19 = vadd.f32 %v2779_v18, %v2066_v17  ;;  %v2768_v20 = vpop.f32.mrb[62].mxu0 }
 0x523   : > { %2115 = vst [vmem:[%s3348_s14 + $0x10] sm:$0xff] %v2776_v15  ;;  %v2784_v22 = vadd.f32 %v2783_v21, %v2768_v20  ;;  %v2069_v23 = vpop.f32.mrb[63].mxu0 }
 0x524   : > { %2113 = vst [vmem:[%s3348_s14] sm:$0xff] %v2780_v19  ;;  %v2788_v25 = vadd.f32 %v2787_v24, %v2069_v23 }
 0x525   : > { %2116 = vst [vmem:[%s3348_s14 + $0x18] sm:$0xff] %v2784_v22 }
 0x526   : > { %2114 = vst [vmem:[%s3348_s14 + $0x8] sm:$0xff] %v2788_v25 }
 0x528   : > { %v2771_v16 = vpop.f32.mrb[64].mxu0 }
 0x529   : > { %v2792_v27 = vadd.f32 %v2791_v26, %v2771_v16  ;;  %v2082_v28 = vpop.f32.mrb[65].mxu0 }
 0x52a   : > { %v2796_v30 = vadd.f32 %v2795_v29, %v2082_v28  ;;  %v2772_v31 = vpop.f32.mrb[66].mxu0 }
 0x52b   : > { %2119 = vst [vmem:[%s3348_s14 + $0x30] sm:$0xff] %v2792_v27  ;;  %v2800_v33 = vadd.f32 %v2799_v32, %v2772_v31  ;;  %v2085_v34 = vpop.f32.mrb[67].mxu0 }
 0x52c   : > { %2117 = vst [vmem:[%s3348_s14 + $0x20] sm:$0xff] %v2796_v30  ;;  %v2804_v36 = vadd.f32 %v2803_v35, %v2085_v34 }
 0x52d   : > { %2120 = vst [vmem:[%s3348_s14 + $0x38] sm:$0xff] %v2800_v33 }
 0x52e   : > { %2118 = vst [vmem:[%s3348_s14 + $0x28] sm:$0xff] %v2804_v36 }
 0x52f   : > { %3011 = shalt.err (!%p3008_p7)
}
 0x530   : > { %s3012_s30 = scalar_lea.hbm %s3554_s13, 1024  ;;  %s3016_s16 = scalar_lea.hbm %s3615_s11, 2048 }
 0x531   : > { %p3013_p8 = scmp.ne.s32.totalorder %s3554_s13, %s3012_s30  ;;  %p3017_p1 = scmp.lt.u32.totalorder %s3554_s13, %s3615_s11 }
 0x532   : > { %p3018_p0 = scmp.lt.u32.totalorder %s3016_s16, %s3012_s30  ;;  %p3020_p6 = scmp.lt.u32.totalorder %s3012_s30, %s3554_s13 }
 0x533   : > { %p3014_p11 = pnand %p3013_p8, %p3627_p9 }
 0x534   : > { %p3019_p5 = por %p3018_p0, %p3017_p1 }
 0x535   : > { %p3015_p13 = pneg %p3014_p11 }
 0x536   : > { %p3021_p10 = por %p3020_p6, %p3019_p5 }
 0x538   : > { %p3022_p12 = pnand %p3021_p10, %p3015_p13 }
 0x53a   : > { %3025 = shalt.err (!%p3022_p12)
}
 0x53b   : > { %s3072_s22 = smov 128   ;;  %s3073_s29 = smov 8  }
 0x53c   : > { %2810 = dma.vmem_to_hbm [thread:$0]  (%p3627_p9), %s3556_s26, 1024, %s3554_s13, %s3563_s21, %s3072_s22, %s3072_s22, %s3073_s29  }
 0x53d PF: > { %p2822_p2 = scmp.ge.s32.totalorder %s3064_s20, 2  ;;  %s2150_s15 = sand.u32 1, %s3052_s17  }
 0x53e   : > { %p3628_p3 = scmp.ne.s32.totalorder %s3621_s28, 0  ;;  %s2151_s30 = scalar_lea.sflag [#allocation4], %s2150_s15 }
 0x540   : > { %p2817_p4 = pnand %p2822_p2, %p3628_p3 }
 0x542   : > { %3047 = dma.done.wait (!%p2817_p4), %s2151_s30, 1024  }
 0x543   : > { %3049 = vsyncadd (!%p2817_p4), %s2151_s30, 4294966272  ;;  %s3629_s14 = sld [smem:[#allocation8_spill]]  ;;  %p22_p7 = scmp.ge.s32.totalorder %s3159_s23, 4  }
 0x544   : > { %s3630_s17 = smov %s3056_s18  ;;  %s3631_s18 = smov %s3060_s19 }
 0x545   : > { %s3633_s20 = smov %s3159_s23  ;;  %24 = sbr.rel (!%p22_p7) target bundleno = 4 (0x4), region = 112 }
 0x549   : > { %s3632_s19 = smov %s3629_s14 }
 0x54c   :  { %2156 = vsyncpa [#allocation3], 1 }
 0x54d   :  { %2158 = vsyncpa [#allocation3 + $0x1], 1 }
 0x54e   :  { %2159 = vsyncpa [#allocation4], 1 }
 0x54f   :  { %2161 = vsyncpa [#allocation4 + $0x1], 1 }

</bundles_post_ra>
